<compile_context>
chip_gen: v7x
topology: tpu7x:2x2x1
jax: 0.10.0
libtpu: 0.0.40
codegen_flags: <defaults>
</compile_context>

<pallas_src>
import functools

import jax
import jax.numpy as jnp
from jax import lax
from jax.experimental import pallas as pl
from jax.experimental.pallas import tpu as pltpu


def _layer_norm(x, g, b, eps=1e-5):
    mu = jnp.mean(x, axis=-1, keepdims=True)
    var = jnp.mean(jnp.square(x - mu), axis=-1, keepdims=True)
    return (x - mu) * lax.rsqrt(var + eps) * g + b


def _gelu_exact(x):
    # PyTorch nn.GELU() default: 0.5 * x * (1 + erf(x / sqrt(2)))
    return 0.5 * x * (1.0 + lax.erf(x * 0.7071067811865476))


def transformer_kernel(heads, dim_head, mxu_dtype,
                       x_ref,
                       ln1g, ln1b, wqkv_ref, wo_ref, bo_ref,
                       ln2g, ln2b, w1_ref, b1_ref, w2_ref, b2_ref,
                       out_ref, o_scr):
    """grid = (batch_tile, layer). One grid step == one transformer layer on one batch tile.

    out_ref holds the running activation (resident across the depth axis)."""
    l = pl.program_id(1)

    @pl.when(l == 0)
    def _():
        out_ref[...] = x_ref[...]          # initialize the resident activation block

    bt, N, D = out_ref.shape
    inner = heads * dim_head
    scale = dim_head ** -0.5

    def mm(a, w):
        # MXU matmul with f32 accumulation; operands cast to the streaming dtype (f32/bf16).
        return jnp.dot(a.astype(mxu_dtype), w.astype(mxu_dtype),
                       preferred_element_type=jnp.float32)

    x2 = out_ref[...].reshape(bt * N, D)   # fold batch*tokens into the matmul M dimension

    # ---- Residual(PreNorm(Attention)) ----
    xn = _layer_norm(x2, ln1g[...], ln1b[...])
    qkv = mm(xn, wqkv_ref[...])            # (bt*N, 3*inner): single fused q/k/v projection

    for h in range(heads):                 # static loop; per-head contraction is intrinsic
        lo = h * dim_head
        qh = qkv[:, lo:lo + dim_head].reshape(bt, N, dim_head)
        kh = qkv[:, inner + lo:inner + lo + dim_head].reshape(bt, N, dim_head)
        vh = qkv[:, 2 * inner + lo:2 * inner + lo + dim_head].reshape(bt, N, dim_head)
        dots = jnp.einsum('bnd,bmd->bnm',
                          qh.astype(mxu_dtype), kh.astype(mxu_dtype),
                          preferred_element_type=jnp.float32) * scale
        m = jnp.max(dots, axis=-1, keepdims=True)      # lane-axis reductions -> XLU
        p = jnp.exp(dots - m)
        s = jnp.sum(p, axis=-1, keepdims=True)
        attn = p * pl.reciprocal(s, approx=True)       # EUP reciprocal, no VALU divide
        oh = jnp.einsum('bnm,bmd->bnd',
                        attn.astype(mxu_dtype), vh.astype(mxu_dtype),
                        preferred_element_type=jnp.float32)
        o_scr[:, :, lo:lo + dim_head] = oh             # concat heads in VMEM scratch

    o = o_scr[...].reshape(bt * N, inner)
    x2 = x2 + mm(o, wo_ref[...]) + bo_ref[...]         # single Wo projection, K = inner

    # ---- Residual(PreNorm(FeedForward)) ----
    xn2 = _layer_norm(x2, ln2g[...], ln2b[...])
    h1 = mm(xn2, w1_ref[...]) + b1_ref[...]
    h1 = _gelu_exact(h1)
    x2 = x2 + mm(h1, w2_ref[...]) + b2_ref[...]

    out_ref[...] = x2.reshape(bt, N, D)


def make_params(key, dim, depth, heads, dim_head, mlp_dim):
    inner = heads * dim_head
    ks = jax.random.split(key, 11)

    def rnd(k, shape, s=0.05):
        return (s * jax.random.normal(k, shape)).astype(jnp.float32)

    return dict(
        ln1_g=1.0 + rnd(ks[0], (depth, 1, dim)),
        ln1_b=rnd(ks[1], (depth, 1, dim)),
        wqkv=rnd(ks[2], (depth, dim, 3 * inner)),      # fused to_qkv (bias-free, like PyTorch)
        wo=rnd(ks[3], (depth, inner, dim)),
        bo=rnd(ks[4], (depth, 1, dim)),
        ln2_g=1.0 + rnd(ks[5], (depth, 1, dim)),
        ln2_b=rnd(ks[6], (depth, 1, dim)),
        w1=rnd(ks[7], (depth, dim, mlp_dim)),
        b1=rnd(ks[8], (depth, 1, mlp_dim)),
        w2=rnd(ks[9], (depth, mlp_dim, dim)),
        b2=rnd(ks[10], (depth, 1, dim)),
    )


def transformer_forward(x, params, *, heads, dim_head, depth, batch_tile=None):
    """NOTE: the input `x` HBM buffer is aliased onto the output (donated)."""
    B, N, D = x.shape
    inner = heads * dim_head
    mlp_dim = params['w1'].shape[-1]
    bt = batch_tile or B
    assert B % bt == 0, (B, bt)
    mxu_dtype = params['wqkv'].dtype       # f32 or bf16 weight streaming

    act_spec = pl.BlockSpec((bt, N, D), lambda i, l: (i, 0, 0))
    per_layer = lambda *shape: pl.BlockSpec((pl.Squeezed(),) + tuple(shape),
                                            lambda i, l: (l, 0, 0))

    # Explicit VMEM budget: activations (in+out blocks) + double-buffered per-layer weights
    # + rough intermediate headroom; floor at 32 MiB, cap below physical VMEM.
    wbytes = jnp.dtype(mxu_dtype).itemsize
    weight_bytes = (D * 3 * inner + inner * D + D * mlp_dim + mlp_dim * D) * wbytes
    bias_bytes = (6 * D + mlp_dim) * 4
    act_bytes = 2 * bt * N * D * 4
    interm_bytes = bt * N * (4 * inner + mlp_dim + heads * N) * 4
    est = act_bytes + 2 * (weight_bytes + bias_bytes) + 4 * interm_bytes
    vmem_limit = int(min(max(2 * est, 32 * 1024 * 1024), 110 * 1024 * 1024))

    kernel = functools.partial(transformer_kernel, heads, dim_head, mxu_dtype)
    out = pl.pallas_call(
        kernel,
        out_shape=jax.ShapeDtypeStruct((B, N, D), jnp.float32),
        grid_spec=pltpu.PrefetchScalarGridSpec(
            num_scalar_prefetch=0,
            grid=(B // bt, depth),
            in_specs=[
                act_spec,
                per_layer(1, D), per_layer(1, D),
                per_layer(D, 3 * inner),
                per_layer(inner, D), per_layer(1, D),
                per_layer(1, D), per_layer(1, D),
                per_layer(D, mlp_dim), per_layer(1, mlp_dim),
                per_layer(mlp_dim, D), per_layer(1, D),
            ],
            out_specs=act_spec,
            scratch_shapes=[pltpu.VMEM((bt, N, inner), jnp.float32)],
        ),
        input_output_aliases={0: 0},       # activation buffer is the in/out HBM buffer
        compiler_params=pltpu.CompilerParams(
            dimension_semantics=("parallel", "arbitrary"),
            vmem_limit_bytes=vmem_limit),
    )(x,
      params['ln1_g'], params['ln1_b'],
      params['wqkv'], params['wo'], params['bo'],
      params['ln2_g'], params['ln2_b'],
      params['w1'], params['b1'],
      params['w2'], params['b2'])
    return out


# ---------- pure-JAX reference (mirrors the PyTorch module, all f32) ----------
def transformer_reference(x, params, *, heads, dim_head, depth):
    B, N, D = x.shape
    inner = heads * dim_head
    scale = dim_head ** -0.5
    for l in range(depth):
        xn = _layer_norm(x, params['ln1_g'][l][None], params['ln1_b'][l][None])
        qkv = xn @ params['wqkv'][l].astype(jnp.float32)
        q, k, v = jnp.split(qkv, 3, axis=-1)
        q = q.reshape(B, N, heads, dim_head).transpose(0, 2, 1, 3)
        k = k.reshape(B, N, heads, dim_head).transpose(0, 2, 1, 3)
        v = v.reshape(B, N, heads, dim_head).transpose(0, 2, 1, 3)
        dots = jnp.einsum('bhid,bhjd->bhij', q, k) * scale
        attn = jax.nn.softmax(dots, axis=-1)
        o = jnp.einsum('bhij,bhjd->bhid', attn, v)
        o = o.transpose(0, 2, 1, 3).reshape(B, N, inner)
        x = x + o @ params['wo'][l].astype(jnp.float32) + params['bo'][l][None]
        xn2 = _layer_norm(x, params['ln2_g'][l][None], params['ln2_b'][l][None])
        h = _gelu_exact(xn2 @ params['w1'][l].astype(jnp.float32) + params['b1'][l][None])
        x = x + h @ params['w2'][l].astype(jnp.float32) + params['b2'][l][None]
    return x


if __name__ == "__main__":
    seq_len, dim, depth, heads, dim_head, mlp_dim = 8, 32, 2, 4, 16, 64
    batch = 2

    key = jax.random.PRNGKey(0)
    kx, kp = jax.random.split(key)
    x = jax.random.normal(kx, (batch, seq_len, dim), dtype=jnp.float32)
    params = make_params(kp, dim, depth, heads, dim_head, mlp_dim)

    ref = jax.block_until_ready(
        transformer_reference(x, params, heads=heads, dim_head=dim_head, depth=depth))

    # f32 run: whole batch as one tile. (Fresh copy because the input buffer is donated.)
    out = transformer_forward(jnp.array(x, copy=True), params,
                              heads=heads, dim_head=dim_head, depth=depth)
    out = jax.block_until_ready(out)
    assert out.shape == (batch, seq_len, dim), out.shape
    assert jnp.allclose(out, ref, rtol=1e-3, atol=2e-3), \
        float(jnp.max(jnp.abs(out - ref)))

    # bf16 weight-streaming run; batch_tile=1 exercises the parallel batch-tile grid axis.
    params_bf16 = {k: (v.astype(jnp.bfloat16) if k in ('wqkv', 'wo', 'w1', 'w2') else v)
                   for k, v in params.items()}
    out16 = transformer_forward(jnp.array(x, copy=True), params_bf16,
                                heads=heads, dim_head=dim_head, depth=depth,
                                batch_tile=1)
    out16 = jax.block_until_ready(out16)
    assert out16.shape == (batch, seq_len, dim), out16.shape
    assert jnp.allclose(out16, ref, rtol=5e-2, atol=5e-2), \
        float(jnp.max(jnp.abs(out16 - ref)))

    print("KERNEL_OK")
</pallas_src>

<mosaic_0001>
module attributes {stable_mosaic.version = 11 : i64} {
  func.func @transformer_kernel(%arg0: i32, %arg1: i32, %arg2: memref<2x8x32xf32, #tpu.memory_space<vmem>>, %arg3: memref<1x1x32xf32, #tpu.memory_space<vmem>>, %arg4: memref<1x1x32xf32, #tpu.memory_space<vmem>>, %arg5: memref<1x32x192xf32, #tpu.memory_space<vmem>>, %arg6: memref<1x64x32xf32, #tpu.memory_space<vmem>>, %arg7: memref<1x1x32xf32, #tpu.memory_space<vmem>>, %arg8: memref<1x1x32xf32, #tpu.memory_space<vmem>>, %arg9: memref<1x1x32xf32, #tpu.memory_space<vmem>>, %arg10: memref<1x32x64xf32, #tpu.memory_space<vmem>>, %arg11: memref<1x1x64xf32, #tpu.memory_space<vmem>>, %arg12: memref<1x64x32xf32, #tpu.memory_space<vmem>>, %arg13: memref<1x1x32xf32, #tpu.memory_space<vmem>>, %arg14: memref<2x8x32xf32, #tpu.memory_space<vmem>>, %arg15: memref<2x8x64xf32, #tpu.memory_space<vmem>>) attributes {dimension_semantics = [#tpu.dimension_semantics<parallel>, #tpu.dimension_semantics<arbitrary>], iteration_bounds = array<i64: 1, 2>, scalar_prefetch = 0 : i64, scratch_operands = 1 : i64, tpu.core_type = #tpu.core_type<tc>, window_params = [{transform_indices = @transform_0, window_bounds = array<i64: 2, 8, 32>}, {transform_indices = @transform_1, window_bounds = array<i64: 1, 1, 32>}, {transform_indices = @transform_2, window_bounds = array<i64: 1, 1, 32>}, {transform_indices = @transform_3, window_bounds = array<i64: 1, 32, 192>}, {transform_indices = @transform_4, window_bounds = array<i64: 1, 64, 32>}, {transform_indices = @transform_5, window_bounds = array<i64: 1, 1, 32>}, {transform_indices = @transform_6, window_bounds = array<i64: 1, 1, 32>}, {transform_indices = @transform_7, window_bounds = array<i64: 1, 1, 32>}, {transform_indices = @transform_8, window_bounds = array<i64: 1, 32, 64>}, {transform_indices = @transform_9, window_bounds = array<i64: 1, 1, 64>}, {transform_indices = @transform_10, window_bounds = array<i64: 1, 64, 32>}, {transform_indices = @transform_11, window_bounds = array<i64: 1, 1, 32>}, {transform_indices = @transform_12, window_bounds = array<i64: 2, 8, 32>}]} {
    %c0_i32 = arith.constant 0 : i32
    %0 = arith.cmpi eq, %arg1, %c0_i32 : i32
    %1 = arith.extui %0 : i1 to i32
    %c0_i32_0 = arith.constant 0 : i32
    %2 = arith.cmpi ne, %1, %c0_i32_0 : i32
    scf.if %2 {
      %c0_87 = arith.constant 0 : index
      %c0_88 = arith.constant 0 : index
      %c0_89 = arith.constant 0 : index
      %179 = vector.load %arg2[%c0_87, %c0_88, %c0_89] : memref<2x8x32xf32, #tpu.memory_space<vmem>>, vector<2x8x32xf32>
      %c0_90 = arith.constant 0 : index
      %c0_91 = arith.constant 0 : index
      %c0_92 = arith.constant 0 : index
      %180 = vector.load %arg14[%c0_90, %c0_91, %c0_92] : memref<2x8x32xf32, #tpu.memory_space<vmem>>, vector<2x8x32xf32>
      tpu.vector_store %arg14[%c0_90, %c0_91, %c0_92], %179 {strides = array<i32>} : memref<2x8x32xf32, #tpu.memory_space<vmem>>, vector<2x8x32xf32>,
    } else {
    }
    %c0 = arith.constant 0 : index
    %c0_1 = arith.constant 0 : index
    %c0_2 = arith.constant 0 : index
    %3 = vector.load %arg14[%c0, %c0_1, %c0_2] : memref<2x8x32xf32, #tpu.memory_space<vmem>>, vector<2x8x32xf32>
    %4 = vector.shape_cast %3 : vector<2x8x32xf32> to vector<16x32xf32>
    %c0_3 = arith.constant 0 : index
    %c0_4 = arith.constant 0 : index
    %c0_5 = arith.constant 0 : index
    %5 = vector.load %arg3[%c0_3, %c0_4, %c0_5] : memref<1x1x32xf32, #tpu.memory_space<vmem>>, vector<1x1x32xf32>
    %6 = vector.shape_cast %5 : vector<1x1x32xf32> to vector<1x32xf32>
    %c0_6 = arith.constant 0 : index
    %c0_7 = arith.constant 0 : index
    %c0_8 = arith.constant 0 : index
    %7 = vector.load %arg4[%c0_6, %c0_7, %c0_8] : memref<1x1x32xf32, #tpu.memory_space<vmem>>, vector<1x1x32xf32>
    %8 = vector.shape_cast %7 : vector<1x1x32xf32> to vector<1x32xf32>
    %cst = arith.constant dense<0.000000e+00> : vector<16xf32>
    %9 = vector.multi_reduction <add>, %4, %cst [1] : vector<16x32xf32> to vector<16xf32>
    %10 = vector.shape_cast %9 : vector<16xf32> to vector<16x1xf32>
    %cst_9 = arith.constant 3.200000e+01 : f32
    %11 = vector.broadcast %cst_9 : f32 to vector<16x1xf32>
    %12 = arith.divf %10, %11 : vector<16x1xf32>
    %13 = vector.broadcast %12 : vector<16x1xf32> to vector<16x32xf32>
    %14 = arith.subf %4, %13 : vector<16x32xf32>
    %15 = arith.mulf %14, %14 : vector<16x32xf32>
    %cst_10 = arith.constant dense<0.000000e+00> : vector<16xf32>
    %16 = vector.multi_reduction <add>, %15, %cst_10 [1] : vector<16x32xf32> to vector<16xf32>
    %17 = vector.shape_cast %16 : vector<16xf32> to vector<16x1xf32>
    %cst_11 = arith.constant 3.200000e+01 : f32
    %18 = vector.broadcast %cst_11 : f32 to vector<16x1xf32>
    %19 = arith.divf %17, %18 : vector<16x1xf32>
    %20 = vector.broadcast %12 : vector<16x1xf32> to vector<16x32xf32>
    %21 = arith.subf %4, %20 : vector<16x32xf32>
    %cst_12 = arith.constant 9.99999974E-6 : f32
    %22 = vector.broadcast %cst_12 : f32 to vector<16x1xf32>
    %23 = arith.addf %19, %22 : vector<16x1xf32>
    %24 = math.rsqrt %23 : vector<16x1xf32>
    %25 = vector.broadcast %24 : vector<16x1xf32> to vector<16x32xf32>
    %26 = arith.mulf %21, %25 : vector<16x32xf32>
    %27 = vector.broadcast %6 : vector<1x32xf32> to vector<16x32xf32>
    %28 = arith.mulf %26, %27 : vector<16x32xf32>
    %29 = vector.broadcast %8 : vector<1x32xf32> to vector<16x32xf32>
    %30 = arith.addf %28, %29 : vector<16x32xf32>
    %c0_13 = arith.constant 0 : index
    %c0_14 = arith.constant 0 : index
    %c0_15 = arith.constant 0 : index
    %31 = vector.load %arg5[%c0_13, %c0_14, %c0_15] : memref<1x32x192xf32, #tpu.memory_space<vmem>>, vector<1x32x192xf32>
    %32 = vector.shape_cast %31 : vector<1x32x192xf32> to vector<32x192xf32>
    %cst_16 = arith.constant dense<0.000000e+00> : vector<16x192xf32>
    %33 = tpu.matmul %30, %32, %cst_16 {dimension_numbers = #tpu.dot_dimension_numbers<[1], [0], [0], [1], [0, 0, 1, 1], [], []>} : vector<16x32xf32>, vector<32x192xf32>, vector<16x192xf32> -> vector<16x192xf32>
    %34 = vector.extract_strided_slice %33 {offsets = [0, 0], sizes = [16, 16], strides = [1, 1]} : vector<16x192xf32> to vector<16x16xf32>
    %35 = vector.shape_cast %34 : vector<16x16xf32> to vector<2x8x16xf32>
    %36 = vector.extract_strided_slice %33 {offsets = [0, 64], sizes = [16, 16], strides = [1, 1]} : vector<16x192xf32> to vector<16x16xf32>
    %37 = vector.shape_cast %36 : vector<16x16xf32> to vector<2x8x16xf32>
    %38 = vector.extract_strided_slice %33 {offsets = [0, 128], sizes = [16, 16], strides = [1, 1]} : vector<16x192xf32> to vector<16x16xf32>
    %39 = vector.shape_cast %38 : vector<16x16xf32> to vector<2x8x16xf32>
    "tpu.trace_start"() <{level = 10 : i32, message = "bnd,bmd->bnm"}> : () -> ()
    %cst_17 = arith.constant dense<0.000000e+00> : vector<2x8x8xf32>
    %40 = tpu.matmul %35, %37, %cst_17 {dimension_numbers = #tpu.dot_dimension_numbers<[2], [2], [1], [1], [0, 0, 0, 1, 1, 1], [0], [0]>} : vector<2x8x16xf32>, vector<2x8x16xf32>, vector<2x8x8xf32> -> vector<2x8x8xf32>
    "tpu.trace_stop"() : () -> ()
    %cst_18 = arith.constant 2.500000e-01 : f32
    %41 = vector.broadcast %cst_18 : f32 to vector<2x8x8xf32>
    %42 = arith.mulf %40, %41 : vector<2x8x8xf32>
    %cst_19 = arith.constant dense<0xFF800000> : vector<2x8xf32>
    %43 = vector.multi_reduction <maximumf>, %42, %cst_19 [2] : vector<2x8x8xf32> to vector<2x8xf32>
    %44 = vector.shape_cast %43 : vector<2x8xf32> to vector<2x8x1xf32>
    %45 = vector.broadcast %44 : vector<2x8x1xf32> to vector<2x8x8xf32>
    %46 = arith.subf %42, %45 : vector<2x8x8xf32>
    %47 = math.exp %46 : vector<2x8x8xf32>
    %cst_20 = arith.constant dense<0.000000e+00> : vector<2x8xf32>
    %48 = vector.multi_reduction <add>, %47, %cst_20 [2] : vector<2x8x8xf32> to vector<2x8xf32>
    %49 = vector.shape_cast %48 : vector<2x8xf32> to vector<2x8x1xf32>
    %50 = tpu.reciprocal %49 {approx = true} : vector<2x8x1xf32> -> vector<2x8x1xf32>
    %51 = vector.broadcast %50 : vector<2x8x1xf32> to vector<2x8x8xf32>
    %52 = arith.mulf %47, %51 : vector<2x8x8xf32>
    "tpu.trace_start"() <{level = 10 : i32, message = "bnm,bmd->bnd"}> : () -> ()
    %cst_21 = arith.constant dense<0.000000e+00> : vector<2x8x16xf32>
    %53 = tpu.matmul %52, %39, %cst_21 {dimension_numbers = #tpu.dot_dimension_numbers<[2], [1], [1], [2], [0, 0, 0, 1, 1, 2], [0], [0]>} : vector<2x8x8xf32>, vector<2x8x16xf32>, vector<2x8x16xf32> -> vector<2x8x16xf32>
    "tpu.trace_stop"() : () -> ()
    %c0_22 = arith.constant 0 : index
    %c0_23 = arith.constant 0 : index
    %c0_24 = arith.constant 0 : index
    %54 = vector.load %arg15[%c0_22, %c0_23, %c0_24] : memref<2x8x64xf32, #tpu.memory_space<vmem>>, vector<2x8x16xf32>
    tpu.vector_store %arg15[%c0_22, %c0_23, %c0_24], %53 {strides = array<i32>} : memref<2x8x64xf32, #tpu.memory_space<vmem>>, vector<2x8x16xf32>,
    %55 = vector.extract_strided_slice %33 {offsets = [0, 16], sizes = [16, 16], strides = [1, 1]} : vector<16x192xf32> to vector<16x16xf32>
    %56 = vector.shape_cast %55 : vector<16x16xf32> to vector<2x8x16xf32>
    %57 = vector.extract_strided_slice %33 {offsets = [0, 80], sizes = [16, 16], strides = [1, 1]} : vector<16x192xf32> to vector<16x16xf32>
    %58 = vector.shape_cast %57 : vector<16x16xf32> to vector<2x8x16xf32>
    %59 = vector.extract_strided_slice %33 {offsets = [0, 144], sizes = [16, 16], strides = [1, 1]} : vector<16x192xf32> to vector<16x16xf32>
    %60 = vector.shape_cast %59 : vector<16x16xf32> to vector<2x8x16xf32>
    "tpu.trace_start"() <{level = 10 : i32, message = "bnd,bmd->bnm"}> : () -> ()
    %cst_25 = arith.constant dense<0.000000e+00> : vector<2x8x8xf32>
    %61 = tpu.matmul %56, %58, %cst_25 {dimension_numbers = #tpu.dot_dimension_numbers<[2], [2], [1], [1], [0, 0, 0, 1, 1, 1], [0], [0]>} : vector<2x8x16xf32>, vector<2x8x16xf32>, vector<2x8x8xf32> -> vector<2x8x8xf32>
    "tpu.trace_stop"() : () -> ()
    %cst_26 = arith.constant 2.500000e-01 : f32
    %62 = vector.broadcast %cst_26 : f32 to vector<2x8x8xf32>
    %63 = arith.mulf %61, %62 : vector<2x8x8xf32>
    %cst_27 = arith.constant dense<0xFF800000> : vector<2x8xf32>
    %64 = vector.multi_reduction <maximumf>, %63, %cst_27 [2] : vector<2x8x8xf32> to vector<2x8xf32>
    %65 = vector.shape_cast %64 : vector<2x8xf32> to vector<2x8x1xf32>
    %66 = vector.broadcast %65 : vector<2x8x1xf32> to vector<2x8x8xf32>
    %67 = arith.subf %63, %66 : vector<2x8x8xf32>
    %68 = math.exp %67 : vector<2x8x8xf32>
    %cst_28 = arith.constant dense<0.000000e+00> : vector<2x8xf32>
    %69 = vector.multi_reduction <add>, %68, %cst_28 [2] : vector<2x8x8xf32> to vector<2x8xf32>
    %70 = vector.shape_cast %69 : vector<2x8xf32> to vector<2x8x1xf32>
    %71 = tpu.reciprocal %70 {approx = true} : vector<2x8x1xf32> -> vector<2x8x1xf32>
    %72 = vector.broadcast %71 : vector<2x8x1xf32> to vector<2x8x8xf32>
    %73 = arith.mulf %68, %72 : vector<2x8x8xf32>
    "tpu.trace_start"() <{level = 10 : i32, message = "bnm,bmd->bnd"}> : () -> ()
    %cst_29 = arith.constant dense<0.000000e+00> : vector<2x8x16xf32>
    %74 = tpu.matmul %73, %60, %cst_29 {dimension_numbers = #tpu.dot_dimension_numbers<[2], [1], [1], [2], [0, 0, 0, 1, 1, 2], [0], [0]>} : vector<2x8x8xf32>, vector<2x8x16xf32>, vector<2x8x16xf32> -> vector<2x8x16xf32>
    "tpu.trace_stop"() : () -> ()
    %c0_30 = arith.constant 0 : index
    %c0_31 = arith.constant 0 : index
    %c16 = arith.constant 16 : index
    %75 = vector.load %arg15[%c0_30, %c0_31, %c16] : memref<2x8x64xf32, #tpu.memory_space<vmem>>, vector<2x8x16xf32>
    tpu.vector_store %arg15[%c0_30, %c0_31, %c16], %74 {strides = array<i32>} : memref<2x8x64xf32, #tpu.memory_space<vmem>>, vector<2x8x16xf32>,
    %76 = vector.extract_strided_slice %33 {offsets = [0, 32], sizes = [16, 16], strides = [1, 1]} : vector<16x192xf32> to vector<16x16xf32>
    %77 = vector.shape_cast %76 : vector<16x16xf32> to vector<2x8x16xf32>
    %78 = vector.extract_strided_slice %33 {offsets = [0, 96], sizes = [16, 16], strides = [1, 1]} : vector<16x192xf32> to vector<16x16xf32>
    %79 = vector.shape_cast %78 : vector<16x16xf32> to vector<2x8x16xf32>
    %80 = vector.extract_strided_slice %33 {offsets = [0, 160], sizes = [16, 16], strides = [1, 1]} : vector<16x192xf32> to vector<16x16xf32>
    %81 = vector.shape_cast %80 : vector<16x16xf32> to vector<2x8x16xf32>
    "tpu.trace_start"() <{level = 10 : i32, message = "bnd,bmd->bnm"}> : () -> ()
    %cst_32 = arith.constant dense<0.000000e+00> : vector<2x8x8xf32>
    %82 = tpu.matmul %77, %79, %cst_32 {dimension_numbers = #tpu.dot_dimension_numbers<[2], [2], [1], [1], [0, 0, 0, 1, 1, 1], [0], [0]>} : vector<2x8x16xf32>, vector<2x8x16xf32>, vector<2x8x8xf32> -> vector<2x8x8xf32>
    "tpu.trace_stop"() : () -> ()
    %cst_33 = arith.constant 2.500000e-01 : f32
    %83 = vector.broadcast %cst_33 : f32 to vector<2x8x8xf32>
    %84 = arith.mulf %82, %83 : vector<2x8x8xf32>
    %cst_34 = arith.constant dense<0xFF800000> : vector<2x8xf32>
    %85 = vector.multi_reduction <maximumf>, %84, %cst_34 [2] : vector<2x8x8xf32> to vector<2x8xf32>
    %86 = vector.shape_cast %85 : vector<2x8xf32> to vector<2x8x1xf32>
    %87 = vector.broadcast %86 : vector<2x8x1xf32> to vector<2x8x8xf32>
    %88 = arith.subf %84, %87 : vector<2x8x8xf32>
    %89 = math.exp %88 : vector<2x8x8xf32>
    %cst_35 = arith.constant dense<0.000000e+00> : vector<2x8xf32>
    %90 = vector.multi_reduction <add>, %89, %cst_35 [2] : vector<2x8x8xf32> to vector<2x8xf32>
    %91 = vector.shape_cast %90 : vector<2x8xf32> to vector<2x8x1xf32>
    %92 = tpu.reciprocal %91 {approx = true} : vector<2x8x1xf32> -> vector<2x8x1xf32>
    %93 = vector.broadcast %92 : vector<2x8x1xf32> to vector<2x8x8xf32>
    %94 = arith.mulf %89, %93 : vector<2x8x8xf32>
    "tpu.trace_start"() <{level = 10 : i32, message = "bnm,bmd->bnd"}> : () -> ()
    %cst_36 = arith.constant dense<0.000000e+00> : vector<2x8x16xf32>
    %95 = tpu.matmul %94, %81, %cst_36 {dimension_numbers = #tpu.dot_dimension_numbers<[2], [1], [1], [2], [0, 0, 0, 1, 1, 2], [0], [0]>} : vector<2x8x8xf32>, vector<2x8x16xf32>, vector<2x8x16xf32> -> vector<2x8x16xf32>
    "tpu.trace_stop"() : () -> ()
    %c0_37 = arith.constant 0 : index
    %c0_38 = arith.constant 0 : index
    %c32 = arith.constant 32 : index
    %96 = vector.load %arg15[%c0_37, %c0_38, %c32] : memref<2x8x64xf32, #tpu.memory_space<vmem>>, vector<2x8x16xf32>
    tpu.vector_store %arg15[%c0_37, %c0_38, %c32], %95 {strides = array<i32>} : memref<2x8x64xf32, #tpu.memory_space<vmem>>, vector<2x8x16xf32>,
    %97 = vector.extract_strided_slice %33 {offsets = [0, 48], sizes = [16, 16], strides = [1, 1]} : vector<16x192xf32> to vector<16x16xf32>
    %98 = vector.shape_cast %97 : vector<16x16xf32> to vector<2x8x16xf32>
    %99 = vector.extract_strided_slice %33 {offsets = [0, 112], sizes = [16, 16], strides = [1, 1]} : vector<16x192xf32> to vector<16x16xf32>
    %100 = vector.shape_cast %99 : vector<16x16xf32> to vector<2x8x16xf32>
    %101 = vector.extract_strided_slice %33 {offsets = [0, 176], sizes = [16, 16], strides = [1, 1]} : vector<16x192xf32> to vector<16x16xf32>
    %102 = vector.shape_cast %101 : vector<16x16xf32> to vector<2x8x16xf32>
    "tpu.trace_start"() <{level = 10 : i32, message = "bnd,bmd->bnm"}> : () -> ()
    %cst_39 = arith.constant dense<0.000000e+00> : vector<2x8x8xf32>
    %103 = tpu.matmul %98, %100, %cst_39 {dimension_numbers = #tpu.dot_dimension_numbers<[2], [2], [1], [1], [0, 0, 0, 1, 1, 1], [0], [0]>} : vector<2x8x16xf32>, vector<2x8x16xf32>, vector<2x8x8xf32> -> vector<2x8x8xf32>
    "tpu.trace_stop"() : () -> ()
    %cst_40 = arith.constant 2.500000e-01 : f32
    %104 = vector.broadcast %cst_40 : f32 to vector<2x8x8xf32>
    %105 = arith.mulf %103, %104 : vector<2x8x8xf32>
    %cst_41 = arith.constant dense<0xFF800000> : vector<2x8xf32>
    %106 = vector.multi_reduction <maximumf>, %105, %cst_41 [2] : vector<2x8x8xf32> to vector<2x8xf32>
    %107 = vector.shape_cast %106 : vector<2x8xf32> to vector<2x8x1xf32>
    %108 = vector.broadcast %107 : vector<2x8x1xf32> to vector<2x8x8xf32>
    %109 = arith.subf %105, %108 : vector<2x8x8xf32>
    %110 = math.exp %109 : vector<2x8x8xf32>
    %cst_42 = arith.constant dense<0.000000e+00> : vector<2x8xf32>
    %111 = vector.multi_reduction <add>, %110, %cst_42 [2] : vector<2x8x8xf32> to vector<2x8xf32>
    %112 = vector.shape_cast %111 : vector<2x8xf32> to vector<2x8x1xf32>
    %113 = tpu.reciprocal %112 {approx = true} : vector<2x8x1xf32> -> vector<2x8x1xf32>
    %114 = vector.broadcast %113 : vector<2x8x1xf32> to vector<2x8x8xf32>
    %115 = arith.mulf %110, %114 : vector<2x8x8xf32>
    "tpu.trace_start"() <{level = 10 : i32, message = "bnm,bmd->bnd"}> : () -> ()
    %cst_43 = arith.constant dense<0.000000e+00> : vector<2x8x16xf32>
    %116 = tpu.matmul %115, %102, %cst_43 {dimension_numbers = #tpu.dot_dimension_numbers<[2], [1], [1], [2], [0, 0, 0, 1, 1, 2], [0], [0]>} : vector<2x8x8xf32>, vector<2x8x16xf32>, vector<2x8x16xf32> -> vector<2x8x16xf32>
    "tpu.trace_stop"() : () -> ()
    %c0_44 = arith.constant 0 : index
    %c0_45 = arith.constant 0 : index
    %c48 = arith.constant 48 : index
    %117 = vector.load %arg15[%c0_44, %c0_45, %c48] : memref<2x8x64xf32, #tpu.memory_space<vmem>>, vector<2x8x16xf32>
    tpu.vector_store %arg15[%c0_44, %c0_45, %c48], %116 {strides = array<i32>} : memref<2x8x64xf32, #tpu.memory_space<vmem>>, vector<2x8x16xf32>,
    %c0_46 = arith.constant 0 : index
    %c0_47 = arith.constant 0 : index
    %c0_48 = arith.constant 0 : index
    %118 = vector.load %arg15[%c0_46, %c0_47, %c0_48] : memref<2x8x64xf32, #tpu.memory_space<vmem>>, vector<2x8x64xf32>
    %119 = vector.shape_cast %118 : vector<2x8x64xf32> to vector<16x64xf32>
    %c0_49 = arith.constant 0 : index
    %c0_50 = arith.constant 0 : index
    %c0_51 = arith.constant 0 : index
    %120 = vector.load %arg6[%c0_49, %c0_50, %c0_51] : memref<1x64x32xf32, #tpu.memory_space<vmem>>, vector<1x64x32xf32>
    %121 = vector.shape_cast %120 : vector<1x64x32xf32> to vector<64x32xf32>
    %cst_52 = arith.constant dense<0.000000e+00> : vector<16x32xf32>
    %122 = tpu.matmul %119, %121, %cst_52 {dimension_numbers = #tpu.dot_dimension_numbers<[1], [0], [0], [1], [0, 0, 1, 1], [], []>} : vector<16x64xf32>, vector<64x32xf32>, vector<16x32xf32> -> vector<16x32xf32>
    %123 = arith.addf %4, %122 : vector<16x32xf32>
    %c0_53 = arith.constant 0 : index
    %c0_54 = arith.constant 0 : index
    %c0_55 = arith.constant 0 : index
    %124 = vector.load %arg7[%c0_53, %c0_54, %c0_55] : memref<1x1x32xf32, #tpu.memory_space<vmem>>, vector<1x1x32xf32>
    %125 = vector.shape_cast %124 : vector<1x1x32xf32> to vector<1x32xf32>
    %126 = vector.broadcast %125 : vector<1x32xf32> to vector<16x32xf32>
    %127 = arith.addf %123, %126 : vector<16x32xf32>
    %c0_56 = arith.constant 0 : index
    %c0_57 = arith.constant 0 : index
    %c0_58 = arith.constant 0 : index
    %128 = vector.load %arg8[%c0_56, %c0_57, %c0_58] : memref<1x1x32xf32, #tpu.memory_space<vmem>>, vector<1x1x32xf32>
    %129 = vector.shape_cast %128 : vector<1x1x32xf32> to vector<1x32xf32>
    %c0_59 = arith.constant 0 : index
    %c0_60 = arith.constant 0 : index
    %c0_61 = arith.constant 0 : index
    %130 = vector.load %arg9[%c0_59, %c0_60, %c0_61] : memref<1x1x32xf32, #tpu.memory_space<vmem>>, vector<1x1x32xf32>
    %131 = vector.shape_cast %130 : vector<1x1x32xf32> to vector<1x32xf32>
    %cst_62 = arith.constant dense<0.000000e+00> : vector<16xf32>
    %132 = vector.multi_reduction <add>, %127, %cst_62 [1] : vector<16x32xf32> to vector<16xf32>
    %133 = vector.shape_cast %132 : vector<16xf32> to vector<16x1xf32>
    %cst_63 = arith.constant 3.200000e+01 : f32
    %134 = vector.broadcast %cst_63 : f32 to vector<16x1xf32>
    %135 = arith.divf %133, %134 : vector<16x1xf32>
    %136 = vector.broadcast %135 : vector<16x1xf32> to vector<16x32xf32>
    %137 = arith.subf %127, %136 : vector<16x32xf32>
    %138 = arith.mulf %137, %137 : vector<16x32xf32>
    %cst_64 = arith.constant dense<0.000000e+00> : vector<16xf32>
    %139 = vector.multi_reduction <add>, %138, %cst_64 [1] : vector<16x32xf32> to vector<16xf32>
    %140 = vector.shape_cast %139 : vector<16xf32> to vector<16x1xf32>
    %cst_65 = arith.constant 3.200000e+01 : f32
    %141 = vector.broadcast %cst_65 : f32 to vector<16x1xf32>
    %142 = arith.divf %140, %141 : vector<16x1xf32>
    %143 = vector.broadcast %135 : vector<16x1xf32> to vector<16x32xf32>
    %144 = arith.subf %127, %143 : vector<16x32xf32>
    %cst_66 = arith.constant 9.99999974E-6 : f32
    %145 = vector.broadcast %cst_66 : f32 to vector<16x1xf32>
    %146 = arith.addf %142, %145 : vector<16x1xf32>
    %147 = math.rsqrt %146 : vector<16x1xf32>
    %148 = vector.broadcast %147 : vector<16x1xf32> to vector<16x32xf32>
    %149 = arith.mulf %144, %148 : vector<16x32xf32>
    %150 = vector.broadcast %129 : vector<1x32xf32> to vector<16x32xf32>
    %151 = arith.mulf %149, %150 : vector<16x32xf32>
    %152 = vector.broadcast %131 : vector<1x32xf32> to vector<16x32xf32>
    %153 = arith.addf %151, %152 : vector<16x32xf32>
    %c0_67 = arith.constant 0 : index
    %c0_68 = arith.constant 0 : index
    %c0_69 = arith.constant 0 : index
    %154 = vector.load %arg10[%c0_67, %c0_68, %c0_69] : memref<1x32x64xf32, #tpu.memory_space<vmem>>, vector<1x32x64xf32>
    %155 = vector.shape_cast %154 : vector<1x32x64xf32> to vector<32x64xf32>
    %cst_70 = arith.constant dense<0.000000e+00> : vector<16x64xf32>
    %156 = tpu.matmul %153, %155, %cst_70 {dimension_numbers = #tpu.dot_dimension_numbers<[1], [0], [0], [1], [0, 0, 1, 1], [], []>} : vector<16x32xf32>, vector<32x64xf32>, vector<16x64xf32> -> vector<16x64xf32>
    %c0_71 = arith.constant 0 : index
    %c0_72 = arith.constant 0 : index
    %c0_73 = arith.constant 0 : index
    %157 = vector.load %arg11[%c0_71, %c0_72, %c0_73] : memref<1x1x64xf32, #tpu.memory_space<vmem>>, vector<1x1x64xf32>
    %158 = vector.shape_cast %157 : vector<1x1x64xf32> to vector<1x64xf32>
    %159 = vector.broadcast %158 : vector<1x64xf32> to vector<16x64xf32>
    %160 = arith.addf %156, %159 : vector<16x64xf32>
    %cst_74 = arith.constant 5.000000e-01 : f32
    %161 = vector.broadcast %cst_74 : f32 to vector<16x64xf32>
    %162 = arith.mulf %161, %160 : vector<16x64xf32>
    %cst_75 = arith.constant 0.707106769 : f32
    %163 = vector.broadcast %cst_75 : f32 to vector<16x64xf32>
    %164 = arith.mulf %160, %163 : vector<16x64xf32>
    %165 = math.erf %164 : vector<16x64xf32>
    %cst_76 = arith.constant 1.000000e+00 : f32
    %166 = vector.broadcast %cst_76 : f32 to vector<16x64xf32>
    %167 = arith.addf %166, %165 : vector<16x64xf32>
    %168 = arith.mulf %162, %167 : vector<16x64xf32>
    %c0_77 = arith.constant 0 : index
    %c0_78 = arith.constant 0 : index
    %c0_79 = arith.constant 0 : index
    %169 = vector.load %arg12[%c0_77, %c0_78, %c0_79] : memref<1x64x32xf32, #tpu.memory_space<vmem>>, vector<1x64x32xf32>
    %170 = vector.shape_cast %169 : vector<1x64x32xf32> to vector<64x32xf32>
    %cst_80 = arith.constant dense<0.000000e+00> : vector<16x32xf32>
    %171 = tpu.matmul %168, %170, %cst_80 {dimension_numbers = #tpu.dot_dimension_numbers<[1], [0], [0], [1], [0, 0, 1, 1], [], []>} : vector<16x64xf32>, vector<64x32xf32>, vector<16x32xf32> -> vector<16x32xf32>
    %172 = arith.addf %127, %171 : vector<16x32xf32>
    %c0_81 = arith.constant 0 : index
    %c0_82 = arith.constant 0 : index
    %c0_83 = arith.constant 0 : index
    %173 = vector.load %arg13[%c0_81, %c0_82, %c0_83] : memref<1x1x32xf32, #tpu.memory_space<vmem>>, vector<1x1x32xf32>
    %174 = vector.shape_cast %173 : vector<1x1x32xf32> to vector<1x32xf32>
    %175 = vector.broadcast %174 : vector<1x32xf32> to vector<16x32xf32>
    %176 = arith.addf %172, %175 : vector<16x32xf32>
    %177 = vector.shape_cast %176 : vector<16x32xf32> to vector<2x8x32xf32>
    %c0_84 = arith.constant 0 : index
    %c0_85 = arith.constant 0 : index
    %c0_86 = arith.constant 0 : index
    %178 = vector.load %arg14[%c0_84, %c0_85, %c0_86] : memref<2x8x32xf32, #tpu.memory_space<vmem>>, vector<2x8x32xf32>
    tpu.vector_store %arg14[%c0_84, %c0_85, %c0_86], %177 {strides = array<i32>} : memref<2x8x32xf32, #tpu.memory_space<vmem>>, vector<2x8x32xf32>,
    return
  }
  func.func @transform_0(%arg0: i32, %arg1: i32) -> (i32, i32, i32) {
    %c0_i32 = arith.constant 0 : i32
    %c0_i32_0 = arith.constant 0 : i32
    %c0_i32_1 = arith.constant 0 : i32
    return %arg0, %c0_i32, %c0_i32_0 : i32, i32, i32
  }
  func.func @transform_1(%arg0: i32, %arg1: i32) -> (i32, i32, i32) {
    %c0_i32 = arith.constant 0 : i32
    %c0_i32_0 = arith.constant 0 : i32
    %c0_i32_1 = arith.constant 0 : i32
    return %arg1, %c0_i32, %c0_i32_0 : i32, i32, i32
  }
  func.func @transform_2(%arg0: i32, %arg1: i32) -> (i32, i32, i32) {
    %c0_i32 = arith.constant 0 : i32
    %c0_i32_0 = arith.constant 0 : i32
    %c0_i32_1 = arith.constant 0 : i32
    return %arg1, %c0_i32, %c0_i32_0 : i32, i32, i32
  }
  func.func @transform_3(%arg0: i32, %arg1: i32) -> (i32, i32, i32) {
    %c0_i32 = arith.constant 0 : i32
    %c0_i32_0 = arith.constant 0 : i32
    %c0_i32_1 = arith.constant 0 : i32
    return %arg1, %c0_i32, %c0_i32_0 : i32, i32, i32
  }
  func.func @transform_4(%arg0: i32, %arg1: i32) -> (i32, i32, i32) {
    %c0_i32 = arith.constant 0 : i32
    %c0_i32_0 = arith.constant 0 : i32
    %c0_i32_1 = arith.constant 0 : i32
    return %arg1, %c0_i32, %c0_i32_0 : i32, i32, i32
  }
  func.func @transform_5(%arg0: i32, %arg1: i32) -> (i32, i32, i32) {
    %c0_i32 = arith.constant 0 : i32
    %c0_i32_0 = arith.constant 0 : i32
    %c0_i32_1 = arith.constant 0 : i32
    return %arg1, %c0_i32, %c0_i32_0 : i32, i32, i32
  }
  func.func @transform_6(%arg0: i32, %arg1: i32) -> (i32, i32, i32) {
    %c0_i32 = arith.constant 0 : i32
    %c0_i32_0 = arith.constant 0 : i32
    %c0_i32_1 = arith.constant 0 : i32
    return %arg1, %c0_i32, %c0_i32_0 : i32, i32, i32
  }
  func.func @transform_7(%arg0: i32, %arg1: i32) -> (i32, i32, i32) {
    %c0_i32 = arith.constant 0 : i32
    %c0_i32_0 = arith.constant 0 : i32
    %c0_i32_1 = arith.constant 0 : i32
    return %arg1, %c0_i32, %c0_i32_0 : i32, i32, i32
  }
  func.func @transform_8(%arg0: i32, %arg1: i32) -> (i32, i32, i32) {
    %c0_i32 = arith.constant 0 : i32
    %c0_i32_0 = arith.constant 0 : i32
    %c0_i32_1 = arith.constant 0 : i32
    return %arg1, %c0_i32, %c0_i32_0 : i32, i32, i32
  }
  func.func @transform_9(%arg0: i32, %arg1: i32) -> (i32, i32, i32) {
    %c0_i32 = arith.constant 0 : i32
    %c0_i32_0 = arith.constant 0 : i32
    %c0_i32_1 = arith.constant 0 : i32
    return %arg1, %c0_i32, %c0_i32_0 : i32, i32, i32
  }
  func.func @transform_10(%arg0: i32, %arg1: i32) -> (i32, i32, i32) {
    %c0_i32 = arith.constant 0 : i32
    %c0_i32_0 = arith.constant 0 : i32
    %c0_i32_1 = arith.constant 0 : i32
    return %arg1, %c0_i32, %c0_i32_0 : i32, i32, i32
  }
  func.func @transform_11(%arg0: i32, %arg1: i32) -> (i32, i32, i32) {
    %c0_i32 = arith.constant 0 : i32
    %c0_i32_0 = arith.constant 0 : i32
    %c0_i32_1 = arith.constant 0 : i32
    return %arg1, %c0_i32, %c0_i32_0 : i32, i32, i32
  }
  func.func @transform_12(%arg0: i32, %arg1: i32) -> (i32, i32, i32) {
    %c0_i32 = arith.constant 0 : i32
    %c0_i32_0 = arith.constant 0 : i32
    %c0_i32_1 = arith.constant 0 : i32
    return %arg0, %c0_i32, %c0_i32_0 : i32, i32, i32
  }
}

</mosaic_0001>

<bundles_post_ra>
// kernel: tpu_custom_call.1
= control target key start
LH: loop header
LB: loop body
LE: loop exit
PB: predicated region body
PF: predicated region fallthrough
CT: control target
= control target key end

     0   :  { %s3609_s0 = inlined_call_operand.hbm [shape: f32[2,8,32], index: 0, kind: input, shape index: {}, may-alias: {0,12}]   ;;  %s3610_s1 = inlined_call_operand.vmem [shape: f32[2,1,32], index: 1, kind: input, shape index: {}]   ;;  %s3611_s2 = inlined_call_operand.vmem [shape: f32[2,1,32], index: 2, kind: input, shape index: {}]   ;;  %s3612_s3 = inlined_call_operand.vmem [shape: f32[2,32,192], index: 3, kind: input, shape index: {}]   ;;  %s3613_s4 = inlined_call_operand.vmem [shape: f32[2,64,32], index: 4, kind: input, shape index: {}]   ;;  %s3614_s5 = inlined_call_operand.vmem [shape: f32[2,1,32], index: 5, kind: input, shape index: {}]   ;;  %s3615_s6 = inlined_call_operand.vmem [shape: f32[2,1,32], index: 6, kind: input, shape index: {}]   ;;  %s3616_s7 = inlined_call_operand.vmem [shape: f32[2,1,32], index: 7, kind: input, shape index: {}]   ;;  %s3617_s8 = inlined_call_operand.vmem [shape: f32[2,32,64], index: 8, kind: input, shape index: {}]   ;;  %s3618_s9 = inlined_call_operand.vmem [shape: f32[2,1,64], index: 9, kind: input, shape index: {}]   ;;  %s3619_s10 = inlined_call_operand.vmem [shape: f32[2,64,32], index: 10, kind: input, shape index: {}]   ;;  %s3620_s11 = inlined_call_operand.vmem [shape: f32[2,1,32], index: 11, kind: input, shape index: {}]   ;;  %s3621_s12 = inlined_call_operand.hbm [shape: f32[2,8,32], index: 12, kind: output, shape index: {}, may-alias: {0,12}]  }
   0x1   :  { %3628 = sst [smem:[#allocation11_spill]] %s3609_s0 }
   0x2   :  { %3629 = sst [smem:[#allocation12_spill]] %s3612_s3 }
   0x3   :  { %3630 = sst [smem:[#allocation13_spill]] %s3613_s4 }
   0x4   :  { %3631 = sst [smem:[#allocation14_spill]] %s3621_s12 }
   0x5   :  { %17 = vsyncpa [#allocation4], 0 }
   0x6   :  { %18 = vsyncpa [#allocation5], 0  ;;  %s3199_s21 = smov 0   ;;  %s3201_s22 = smov 0  }
   0x7   :  { %s3203_s23 = smov 0  }
   0x8 LB: > { %3632 = sst [smem:[#allocation9_spill]] %s3113_s22  ;;  %s3625_s24 = sadd.s32 4294967295, %s3117_s23   ;;  %s3117_s23 = sphi %s3203_s23, %s24_s23   ;;  %s3113_s22 = sphi %s3201_s22, %s3649_s22   ;;  %s3109_s21 = sphi %s3199_s21, %s3648_s21  }
   0x9   : > { %s33_s25 = sadd.s32 1, %s3113_s22  ;;  %p2634_p1 = scmp.ge.s32.totalorder %s3117_s23, 1 }
   0xa   : > { %p34_p0 = scmp.ge.s32.totalorder %s33_s25, 2  ;;  %p379_p2 = scmp.lt.s32.totalorder %s3117_s23, 3 }
   0xb   : > { %p3226_p4 = scmp.eq.s32.totalorder %s3625_s24, 0  ;;  %s3119_s28 = smov [#allocation3]  }
   0xc   : > { %s3651_s25 = smov (%p34_p0, %s33_s25), 0  ;;  %p3220_p3 = pnand %p2634_p1, %p379_p2 }
   0xd   : > { %3633 = sst [smem:[#allocation10_spill]] %s3651_s25  ;;  %s394_s29 = sshll.u32 %s3119_s28, 4  ;;  %s395_s29 = int_to_ptr.vmem [resolvable:$true] %s394_s29 }
   0xe   : > { %s3634_s26 = scalar_select %p3220_p3, 1, 0 }
   0xf   : > { %s3635_s27 = scalar_select %p3226_p4, 1, 0 }
  0x10   : > { %p2942_p5 = pneg %p3220_p3  ;;  %s3637_s0 = sld [smem:[#allocation11_spill]] }
  0x12   : > { %p3234_p6 = pnand %p3226_p4, %p2942_p5 }
  0x14   : > { %p3035_p8 = pneg %p3234_p6 }
  0x16   : > { %s3033_s15 = scalar_lea.hbm %s3637_s0, 256 }
  0x17   : > { %p3034_p7 = scmp.ne.s32.totalorder %s3637_s0, %s3033_s15  ;;  %p3040_p11 = scmp.lt.u32.totalorder %s3033_s15, %s3637_s0 }
  0x19   : > { %p3036_p9 = pnand %p3035_p8, %p3034_p7 }
  0x1b   : > { %p3037_p10 = pneg %p3036_p9 }
  0x1d   : > { %p3042_p12 = pnand %p3040_p11, %p3037_p10 }
  0x1f   : > { %3045 = shalt.err (!%p3042_p12)
}
  0x20   : > { %s3046_s20 = scalar_lea.vmem %s395_s29, 256  ;;  %p3054_p2 = scmp.lt.s32.totalorder %s395_s29, %s395_s29 }
  0x21   : > { %p3047_p13 = scmp.ne.s32.totalorder %s395_s29, %s3046_s20  ;;  %p3055_p5 = scmp.lt.s32.totalorder %s3046_s20, %s3046_s20 }
  0x23   : > { %p3049_p0 = pnand %p3047_p13, %p3035_p8  ;;  %p3056_p4 = por %p3055_p5, %p3054_p2 }
  0x25   : > { %p3050_p1 = pneg %p3049_p0 }
  0x27   : > { %p3057_p3 = pnand %p3056_p4, %p3050_p1 }
  0x29   : > { %3060 = shalt.err (!%p3057_p3)
}
  0x2a   : > { %s3120_s28 = smov 128   ;;  %s3121_s13 = smov 8  }
  0x2b   : > { %2945 = dma.hbm_to_vmem [thread:$0]  (!%p3234_p6), %s3637_s0, 256, %s395_s29, [#allocation4], %s3120_s28, %s3120_s28, %s3121_s13  }
  0x2c   : > { %p3638_p7 = scmp.ne.s32.totalorder %s3634_s26, 0 }
  0x2d   : > { %p3639_p9 = scmp.ne.s32.totalorder (!%p3638_p7), %s3635_s27, 0 }
  0x2e   : > { %484 = sbr.rel (%p3638_p7) target bundleno = 4178 (0x1052), region = 68 }
  0x35   : > { %3100 = dma.done.wait (%p3639_p9), [#allocation4], 256  }
  0x36   : > { %3102 = vsyncadd (%p3639_p9), [#allocation4], 4294967040  ;;  %p558_p3 = scmp.lt.s32.totalorder %s3109_s21, 1  ;;  %s3640_s3 = sld [smem:[#allocation12_spill]] }
  0x37   : > { %s3641_s4 = sld [smem:[#allocation13_spill]]  ;;  %p2647_p4 = scmp.ne.s32.totalorder %s3109_s21, 0 }
  0x38   : > { %s3262_s15 = scalar_select %p558_p3, %s3109_s21, 1 }
  0x39   : > { %603 = sbr.rel (%p2647_p4) target bundleno = 64 (0x40), region = 76  ;;  %v604_v0 = vld [vmem:[#allocation3] sm:$0xff] (!%p2647_p4)  ;;  %vm606_vm0 = vcmask (!%p2647_p4), 261120   ;;  %v605_v1 = vld [vmem:[#allocation3 + $0x8] sm:$0xff] (!%p2647_p4) }
  0x3a   : > { %s2691_s19 = sshll.u32 %s3262_s15, 6  ;;  %s579_s27 = scalar_lea.vmem %s3615_s6, %s3262_s15  ;;  %607 = vst.msk [vmem:[#allocation6] sm:$0xff] (!%p2647_p4), %vm606_vm0, %v604_v0  ;;  %608 = vst.msk [vmem:[#allocation6 + $0x8] sm:$0xff] (!%p2647_p4), %vm606_vm0, %v605_v1 }
  0x3b   : > { %s582_s22 = scalar_lea.vmem %s3616_s7, %s3262_s15  ;;  %s2693_s20 = sshll.u32 %s3262_s15, 5 }
  0x3c   : > { %s3280_s30 = scalar_lea.vmem %s3640_s3, %s2691_s19  ;;  %s590_s14 = scalar_lea.vmem %s3618_s9, %s3262_s15 }
  0x3d   : > { %s3285_s0 = scalar_lea.vmem %s3641_s4, %s2691_s19  ;;  %s3303_s12 = scalar_lea.vmem %s3617_s8, %s2693_s20 }
  0x3e   : > { %s3308_s4 = scalar_lea.vmem %s3619_s10, %s2691_s19  ;;  %s598_s18 = scalar_lea.vmem %s3620_s11, %s3262_s15 }
  0x40 PF: > { %vm613_vm1 = vcmask 261120   ;;  %v658_v16 = vld [vmem:[%s3280_s30 + $0x8] sm:$0xff]  ;;  %v660_v17 = vld [vmem:[%s3280_s30 + $0x18] sm:$0xff]  ;;  %v657_v18 = vld [vmem:[%s3280_s30] sm:$0xff]  ;;  %v3122_v23 = vmov 0.0   ;;  %s3642_s19 = scalar_lea.vmem %s3610_s1, %s3262_s15  ;;  %s3643_s29 = scalar_lea.vmem %s3611_s2, %s3262_s15  ;;  %vm3123_vm2 = vmmov 0  }
  0x41   : > { %v3315_v2 = vld [vmem:[#allocation6] sm:$0xff]  ;;  %v3317_v3 = vld [vmem:[#allocation6 + $0x8] sm:$0xff]  ;;  %v2882_v19 = vpack.c.bf16 %v660_v17, %v658_v16  ;;  %v659_v20 = vld [vmem:[%s3280_s30 + $0x10] sm:$0xff]  ;;  %735 = vmatprep.mubr.f32.mxu0 %v3122_v23  ;;  %741 = vmatprep.mubr.f32.mxu1 %v3122_v23  ;;  %s3124_s20 = smov 64   ;;  %vm751_vm3 = vcmask 130048   ;;  %vm905_vm4 = vcmask 64512   ;;  %s3644_s21 = scalar_lea.vmem %s3614_s5, %s3262_s15 }
  0x42   : > { %v614_v4 = vsel %vm613_vm1, %v3315_v2, 0.0  ;;  %v617_v5 = vsel %vm613_vm1, %v3317_v3, 0.0  ;;  %v662_v21 = vld [vmem:[%s3280_s30 + $0x28] sm:$0xff]  ;;  %v664_v22 = vld [vmem:[%s3280_s30 + $0x38] sm:$0xff]  ;;  %v2884_v24 = vpack.c.bf16 %v659_v20, %v657_v18  ;;  %v661_v26 = vld [vmem:[%s3280_s30 + $0x20] sm:$0xff]  ;;  %s3125_s28 = smov 48  }
  0x43   : > { %615 = vadd.xlane.f32.xlu0 %v614_v4  ;;  %v2886_v25 = vpack.c.bf16 %v664_v22, %v662_v21  ;;  %v663_v27 = vld [vmem:[%s3280_s30 + $0x30] sm:$0xff]  ;;  %2883 = vmatprep.subr.bf16.mxu0 %v2882_v19  ;;  %v2648_v36 = vld [vmem:[%s3642_s19] ss:$0 sm:$0xff]  ;;  %s3126_s16 = smov 112   ;;  %s3127_s24 = smov 32   ;;  %vm1418_vm5 = vcmask 261248  }
  0x44   : > { %2930 = vmatprep.subr.bf16.mxu1 %v2882_v19  ;;  %2885 = vmatpush1.bf16.msra.mxu0 %v2884_v24  ;;  %v2888_v28 = vpack.c.bf16 %v663_v27, %v661_v26  ;;  %v2649_v38 = vld [vmem:[%s3643_s29] ss:$0 sm:$0xff]  ;;  %s3128_s17 = smov 96   ;;  %s3129_s25 = smov 16   ;;  %vm1761_vm6 = vcmask 392448   ;;  %vm2104_vm7 = vcmask 523648  }
  0x45   : > { %2932 = vmatpush1.bf16.msra.mxu1 %v2884_v24  ;;  %2887 = vmatprep.subr.bf16.mxu0 %v2886_v25  ;;  %s3130_s26 = smov 80   ;;  %vm2117_vm8 = vcmask 523264   ;;  %s3131_s29 = smov [#allocation6]  }
  0x46   : > { %2931 = vmatprep.subr.bf16.mxu1 %v2886_v25 }
  0x47   : > { %618 = vadd.xlane.f32.xlu0 %v617_v5 }
  0x48   : > { %2889 = vmatpush1.bf16.msra.mxu0 %v2888_v28 }
  0x49   : > { %2933 = vmatpush1.bf16.msra.mxu1 %v2888_v28  ;;  %2768 = vmatprep.subr.mxu0 %v3122_v23 }
  0x4a   : > { %2753 = vmatprep.subr.mxu1 %v3122_v23 }
  0xd0   : > { %v616_v6 = vpop.xlane.xlu0 %615 }
  0xd1   : > { %v621_v7 = vmul.f32 0.03125, %v616_v6 }
  0xd3   : > { %v623_v8 = vsub.f32 %v3315_v2, %v621_v7 }
  0xd4   : > { %v619_v9 = vpop.xlane.xlu0 %618 }
  0xd5   : > { %v622_v10 = vmul.f32 0.03125, %v619_v9  ;;  %v625_v11 = vmul.f32 %v623_v8, %v623_v8 }
  0xd7   : > { %v624_v12 = vsub.f32 %v3317_v3, %v622_v10  ;;  %v627_v13 = vsel %vm613_vm1, %v625_v11, 0.0 }
  0xd8   : > { %628 = vadd.xlane.f32.xlu1 %v627_v13 }
  0xd9   : > { %v626_v14 = vmul.f32 %v624_v12, %v624_v12 }
  0xdb   : > { %v630_v15 = vsel %vm613_vm1, %v626_v14, 0.0 }
  0xdc   : > { %631 = vadd.xlane.f32.xlu1 %v630_v15 }
 0x165   : > { %v629_v29 = vpop.xlane.xlu1 %628 }
 0x166   : > { %v633_v30 = vmul.f32 0.03125, %v629_v29 }
 0x168   : > { %v635_v31 = vadd.f32 1e-05, %v633_v30 }
 0x169   : > { %v632_v32 = vpop.xlane.xlu1 %631 }
 0x16a   : > { %2989 = vrsqrt.f32 %v635_v31  ;;  %v634_v33 = vmul.f32 0.03125, %v632_v32 }
 0x16c   : > { %v636_v34 = vadd.f32 1e-05, %v634_v33 }
 0x16e   : > { %2991 = vrsqrt.f32 %v636_v34 }
 0x174   : > { %v2990_v35 = vpop.eup %2989 }
 0x175   : > { %v639_v37 = vmul.f32 %v2990_v35, %v623_v8 }
 0x177   : > { %v647_v39 = vmul.f32 %v2648_v36, %v639_v37 }
 0x178   : > { %v2992_v40 = vpop.eup %2991 }
 0x179   : > { %v655_v41 = vadd.f32 %v2649_v38, %v647_v39  ;;  %v640_v42 = vmul.f32 %v2992_v40, %v624_v12 }
 0x17b   : > { %2650 = vmatmul.mubr.msk.f32.vlgmr.msra.gmra.mrb[0].mxu0 %vm613_vm1, %v655_v41  ;;  %v648_v43 = vmul.f32 %v2648_v36, %v640_v42 }
 0x17c   : > { %2770 = vmatprep.mubr.msk.f32.mxu0 %vm3123_vm2, %v3122_v23 }
 0x17d   : > { %v656_v44 = vadd.f32 %v2649_v38, %v648_v43 }
 0x17f   : > { %2651 = vmatmul.mubr.msk.f32.vlgmr.msra.gmra.mrb[0].mxu1 %vm613_vm1, %v656_v44 }
 0x180   : > { %2755 = vmatprep.mubr.msk.f32.mxu1 %vm3123_vm2, %v3122_v23 }
 0x24e   : > { %v3355_v45 = vpop.f32.mrb[0].mxu0 }
 0x24f   : > { %749 = vrot.lane.b32.xlu0 %v3355_v45, %s3124_s20  ;;  %v3358_v46 = vpop.f32.mrb[1].mxu0 }
 0x252   : > { %v3360_v47 = vpop.f32.mrb[0].mxu1 }
 0x253   : > { %827 = vrot.lane.b32.xlu1 %v3360_v47, %s3124_s20  ;;  %v3363_v48 = vpop.f32.mrb[1].mxu1  ;;  %s2467_s20 = sshll.u32 %s3131_s29, 4  ;;  %s2468_s20 = int_to_ptr.vmem [resolvable:$true] %s2467_s20 }
 0x254   : > { %2769 = vmatpush3.msra.mxu0 %v3363_v48  ;;  %s3061_s15 = scalar_lea.vmem %s2468_s20, 256  ;;  %p3068_p12 = scmp.lt.s32.totalorder %s2468_s20, %s2468_s20 }
 0x255   : > { %2778 = vmatprep.subr.mxu0 %v3122_v23  ;;  %p3062_p8 = scmp.ne.s32.totalorder %s2468_s20, %s3061_s15  ;;  %p3069_p13 = scmp.lt.s32.totalorder %s3061_s15, %s3061_s15 }
 0x257   : > { %p3070_p0 = por %p3069_p13, %p3068_p12 }
 0x2c1   : > { %v750_v49 = vpop.permute.xlu0 %749 }
 0x2c2   : > { %2754 = vmatpush3.xpose.msk.msra.mxu1 %vm751_vm3, %v750_v49 }
 0x2c3   : > { %2758 = vmatprep.subr.mxu1 %v3122_v23 }
 0x2c5   : > { %v828_v50 = vpop.permute.xlu1 %827  ;;  %2756 = vmatmul.mubr.msk.f32.vlgmr.msra.gmra.mrb[2].mxu1 %vm751_vm3, %v3355_v45 }
 0x2c6   : > { %2759 = vmatpush3.xpose.msk.msra.mxu1 %vm751_vm3, %v828_v50  ;;  %2760 = vmatprep.mubr.msk.f32.mxu1 %vm3123_vm2, %v3122_v23 }
 0x2c7   : > { %2763 = vmatprep.subr.mxu1 %v3122_v23 }
 0x2c9   : > { %2761 = vmatmul.mubr.msk.f32.vlgmr.msra.gmra.mrb[4].mxu1 %vm751_vm3, %v3360_v47 }
 0x2ca   : > { %2764 = vmatpush3.msra.mxu1 %v3358_v46  ;;  %2765 = vmatprep.mubr.msk.f32.mxu1 %vm3123_vm2, %v3122_v23 }
 0x2cb   : > { %2773 = vmatprep.subr.mxu1 %v3122_v23 }
 0x398   : > { %v822_v51 = vpop.f32.mrb[2].mxu1 }
 0x399   : > { %v903_v52 = vmul.f32 0.25, %v822_v51  ;;  %v2757_v53 = vpop.f32.mrb[3].mxu1 }
 0x39b   : > { %v906_v54 = vsel %vm905_vm4, %v903_v52, -inf }
 0x39c   : > { %907 = vmax.xlane.f32.xlu1 %v906_v54  ;;  %v899_v55 = vpop.f32.mrb[4].mxu1 }
 0x39d   : > { %v904_v56 = vmul.f32 0.25, %v899_v55  ;;  %v2762_v57 = vpop.f32.mrb[5].mxu1 }
 0x39f   : > { %v909_v58 = vsel %vm905_vm4, %v904_v56, -inf }
 0x3a0   : > { %910 = vmax.xlane.f32.xlu0 %v909_v58 }
 0x3ad   : > { %1156 = vrot.lane.b32.xlu1 %v3360_v47, %s3125_s28 }
 0x3b1   : > { %1076 = vrot.lane.b32.xlu1 %v3355_v45, %s3126_s16 }
 0x429   : > { %v908_v59 = vpop.xlane.xlu1 %907 }
 0x42a   : > { %v912_v60 = vsub.f32 %v903_v52, %v908_v59 }
 0x42c   : > { %v914_v61 = vmul.f32 1.442695, %v912_v60 }
 0x42d   : > { %v911_v62 = vpop.xlane.xlu0 %910  ;;  %v1157_v7 = vpop.permute.xlu1 %1156 }
 0x42e   : > { %2993 = vpow2.f32 %v914_v61  ;;  %v913_v63 = vsub.f32 %v904_v56, %v911_v62 }
 0x430   : > { %v916_v0 = vmul.f32 1.442695, %v913_v63 }
 0x431   : > { %v1077_v8 = vpop.permute.xlu1 %1076 }
 0x432   : > { %2995 = vpow2.f32 %v916_v0 }
 0x438   : > { %v2994_v1 = vpop.eup %2993 }
 0x439   : > { %v918_v4 = vsel %vm905_vm4, %v2994_v1, 0.0 }
 0x43a   : > { %919 = vadd.xlane.f32.xlu0 %v918_v4 }
 0x43c   : > { %v2996_v5 = vpop.eup %2995 }
 0x43d   : > { %v921_v6 = vsel %vm905_vm4, %v2996_v5, 0.0 }
 0x43e   : > { %922 = vadd.xlane.f32.xlu1 %v921_v6 }
 0x44f   : > { %1154 = vrot.lane.b32.xlu1 %v3360_v47, %s3126_s16 }
 0x450   : > { %1078 = vrot.lane.b32.xlu0 %v3355_v45, %s3125_s28 }
 0x4c7   : > { %v920_v9 = vpop.xlane.xlu0 %919 }
 0x4c8   : > { %2997 = vrcp.f32 %v920_v9 }
 0x4cb   : > { %v923_v10 = vpop.xlane.xlu1 %922  ;;  %v1079_v13 = vpop.permute.xlu0 %1078 }
 0x4cc   : > { %2999 = vrcp.f32 %v923_v10 }
 0x4cf   : > { %v1155_v16 = vpop.permute.xlu1 %1154 }
 0x4d2   : > { %v2998_v11 = vpop.eup %2997 }
 0x4d3   : > { %v926_v12 = vmul.f32 %v2998_v11, %v2994_v1 }
 0x4d5   : > { %2766 = vmatmul.mubr.msk.f32.vlgmr.msra.gmra.mrb[6].mxu1 %vm905_vm4, %v926_v12 }
 0x4d6   : > { %v3000_v14 = vpop.eup %2999  ;;  %2774 = vmatpush3.xpose.msk.msra.mxu1 %vm751_vm3, %v1079_v13  ;;  %2775 = vmatprep.mubr.msk.f32.mxu1 %vm3123_vm2, %v3122_v23 }
 0x4d7   : > { %v927_v15 = vmul.f32 %v3000_v14, %v2996_v5  ;;  %2783 = vmatprep.subr.mxu1 %v3122_v23 }
 0x4d9   : > { %2771 = vmatmul.mubr.msk.f32.vlgmr.msra.gmra.mrb[2].mxu0 %vm905_vm4, %v927_v15  ;;  %2776 = vmatmul.mubr.msk.f32.vlgmr.msra.gmra.mrb[8].mxu1 %vm751_vm3, %v1077_v8 }
 0x4da   : > { %2779 = vmatpush3.xpose.msk.msra.mxu0 %vm751_vm3, %v1157_v7  ;;  %2780 = vmatprep.mubr.msk.f32.mxu0 %vm3123_vm2, %v3122_v23 }
 0x4db   : > { %2788 = vmatprep.subr.mxu0 %v3122_v23  ;;  %2785 = vmatprep.mubr.msk.f32.mxu1 %vm3123_vm2, %v3122_v23 }
 0x4dd   : > { %2781 = vmatmul.mubr.msk.f32.vlgmr.msra.gmra.mrb[4].mxu0 %vm751_vm3, %v1155_v16 }
 0x4de   : > { %2790 = vmatprep.mubr.msk.f32.mxu0 %vm3123_vm2, %v3122_v23 }
 0x5a8   : > { %v997_v17 = vpop.f32.mrb[6].mxu1 }
 0x5a9   : > { %1074 = vst.msk [vmem:[#allocation2] sm:$0xff] %vm751_vm3, %v997_v17  ;;  %v2767_v18 = vpop.f32.mrb[7].mxu1 }
 0x5ac   : > { %v1070_v19 = vpop.f32.mrb[2].mxu0  ;;  %v1150_v20 = vpop.f32.mrb[8].mxu1 }
 0x5ad   : > { %1075 = vst.msk [vmem:[#allocation2 + $0x8] sm:$0xff] %vm751_vm3, %v1070_v19  ;;  %v1232_v21 = vmul.f32 0.25, %v1150_v20  ;;  %v2772_v22 = vpop.f32.mrb[3].mxu0  ;;  %v2777_v24 = vpop.f32.mrb[9].mxu1 }
 0x5af   : > { %v1234_v25 = vsel %vm905_vm4, %v1232_v21, -inf }
 0x5b0   : > { %v1228_v26 = vpop.f32.mrb[4].mxu0  ;;  %1235 = vmax.xlane.f32.xlu0 %v1234_v25 }
 0x5b1   : > { %v1233_v27 = vmul.f32 0.25, %v1228_v26  ;;  %v2782_v28 = vpop.f32.mrb[5].mxu0 }
 0x5b3   : > { %v1237_v29 = vsel %vm905_vm4, %v1233_v27, -inf }
 0x5b4   : > { %1238 = vmax.xlane.f32.xlu1 %v1237_v29 }
 0x5c5   : > { %1334 = vrot.lane.b32.xlu1 %v3363_v48, %s3126_s16 }
 0x5c6   : > { %1257 = vrot.lane.b32.xlu0 %v3358_v46, %s3126_s16 }
 0x5c9   : > { %1423 = vrot.lane.b32.xlu1 %v3355_v45, %s3127_s24 }
 0x5cd   : > { %1501 = vrot.lane.b32.xlu1 %v3360_v47, %s3127_s24 }
 0x5d1   : > { %1499 = vrot.lane.b32.xlu1 %v3360_v47, %s3128_s17 }
 0x63d   : > { %v1236_v30 = vpop.xlane.xlu0 %1235 }
 0x63e   : > { %v1240_v31 = vsub.f32 %v1232_v21, %v1236_v30 }
 0x640   : > { %v1242_v32 = vmul.f32 1.442695, %v1240_v31 }
 0x641   : > { %v1239_v33 = vpop.xlane.xlu1 %1238  ;;  %v1258_v34 = vpop.permute.xlu0 %1257 }
 0x642   : > { %3001 = vpow2.f32 %v1242_v32  ;;  %v1241_v35 = vsub.f32 %v1233_v27, %v1239_v33  ;;  %2784 = vmatpush3.msra.mxu1 %v1258_v34 }
 0x643   : > { %2793 = vmatprep.subr.mxu1 %v3122_v23 }
 0x644   : > { %v1244_v36 = vmul.f32 1.442695, %v1241_v35 }
 0x645   : > { %v1335_v37 = vpop.permute.xlu1 %1334 }
 0x646   : > { %3003 = vpow2.f32 %v1244_v36  ;;  %2789 = vmatpush3.msra.mxu0 %v1335_v37 }
 0x647   : > { %2798 = vmatprep.subr.mxu0 %v3122_v23 }
 0x649   : > { %v1424_v44 = vpop.permute.xlu1 %1423 }
 0x64c   : > { %v3002_v38 = vpop.eup %3001 }
 0x64d   : > { %v1246_v39 = vsel %vm905_vm4, %v3002_v38, 0.0  ;;  %v1502_v52 = vpop.permute.xlu1 %1501 }
 0x64e   : > { %1247 = vadd.xlane.f32.xlu0 %v1246_v39 }
 0x650   : > { %v3004_v40 = vpop.eup %3003 }
 0x651   : > { %v1249_v41 = vsel %vm905_vm4, %v3004_v40, 0.0  ;;  %v1500_v55 = vpop.permute.xlu1 %1499 }
 0x652   : > { %1250 = vadd.xlane.f32.xlu0 %v1249_v41 }
 0x668   : > { %1421 = vrot.lane.b32.xlu0 %v3355_v45, %s3128_s17 }
 0x6db   : > { %v1248_v42 = vpop.xlane.xlu0 %1247 }
 0x6dc   : > { %3005 = vrcp.f32 %v1248_v42 }
 0x6df   : > { %v1251_v43 = vpop.xlane.xlu0 %1250 }
 0x6e0   : > { %3007 = vrcp.f32 %v1251_v43 }
 0x6e3   : > { %v1422_v54 = vpop.permute.xlu0 %1421 }
 0x6e6   : > { %v3006_v49 = vpop.eup %3005 }
 0x6e7   : > { %v1254_v50 = vmul.f32 %v3006_v49, %v3002_v38 }
 0x6e9   : > { %2786 = vmatmul.mubr.msk.f32.vlgmr.msra.gmra.mrb[10].mxu1 %vm905_vm4, %v1254_v50 }
 0x6ea   : > { %v3008_v51 = vpop.eup %3007  ;;  %2794 = vmatpush3.xpose.msk.msra.mxu1 %vm751_vm3, %v1424_v44  ;;  %2795 = vmatprep.mubr.msk.f32.mxu1 %vm3123_vm2, %v3122_v23 }
 0x6eb   : > { %v1255_v53 = vmul.f32 %v3008_v51, %v3004_v40  ;;  %2803 = vmatprep.subr.mxu1 %v3122_v23 }
 0x6ed   : > { %2791 = vmatmul.mubr.msk.f32.vlgmr.msra.gmra.mrb[6].mxu0 %vm905_vm4, %v1255_v53  ;;  %2796 = vmatmul.mubr.msk.f32.vlgmr.msra.gmra.mrb[12].mxu1 %vm751_vm3, %v1422_v54 }
 0x6ee   : > { %2799 = vmatpush3.xpose.msk.msra.mxu0 %vm751_vm3, %v1502_v52  ;;  %2800 = vmatprep.mubr.msk.f32.mxu0 %vm3123_vm2, %v3122_v23 }
 0x6ef   : > { %2808 = vmatprep.subr.mxu0 %v3122_v23  ;;  %2805 = vmatprep.mubr.msk.f32.mxu1 %vm3123_vm2, %v3122_v23 }
 0x6f1   : > { %2801 = vmatmul.mubr.msk.f32.vlgmr.msra.gmra.mrb[8].mxu0 %vm751_vm3, %v1500_v55 }
 0x6f2   : > { %2810 = vmatprep.mubr.msk.f32.mxu0 %vm3123_vm2, %v3122_v23 }
 0x7bc   : > { %v3445_v56 = vpop.f32.mrb[10].mxu1 }
 0x7bd   : > { %v2787_v57 = vpop.f32.mrb[11].mxu1 }
 0x7c0   : > { %v3447_v58 = vpop.f32.mrb[6].mxu0  ;;  %v1495_v59 = vpop.f32.mrb[12].mxu1 }
 0x7c1   : > { %v1577_v60 = vmul.f32 0.25, %v1495_v59  ;;  %v2792_v61 = vpop.f32.mrb[7].mxu0  ;;  %v2797_v62 = vpop.f32.mrb[13].mxu1 }
 0x7c2   : > { %v2109_v62 = vld [vmem:[%s3285_s0] sm:$0xff] }
 0x7c3   : > { %v1579_v63 = vsel %vm905_vm4, %v1577_v60, -inf }
 0x7c4   : > { %v1573_v0 = vpop.f32.mrb[8].mxu0  ;;  %1580 = vmax.xlane.f32.xlu0 %v1579_v63  ;;  %v2110_v63 = vld [vmem:[%s3285_s0 + $0x8] sm:$0xff] }
 0x7c5   : > { %v1578_v1 = vmul.f32 0.25, %v1573_v0  ;;  %v2802_v4 = vpop.f32.mrb[9].mxu0  ;;  %v2890_v0 = vpack.c.bf16 %v2110_v63, %v2109_v62  ;;  %v2358_v62 = vld [vmem:[%s3308_s4 + $0x10] sm:$0xff]  ;;  %v2359_v63 = vld [vmem:[%s3308_s4 + $0x18] sm:$0xff] }
 0x7c6   : > { %v2112_v4 = vld [vmem:[%s3285_s0 + $0x18] sm:$0xff] }
 0x7c7   : > { %v1582_v5 = vsel %vm905_vm4, %v1578_v1, -inf }
 0x7c8   : > { %1583 = vmax.xlane.f32.xlu1 %v1582_v5 }
 0x7d9   : > { %1677 = vrot.lane.b32.xlu1 %v3363_v48, %s3128_s17 }
 0x7da   : > { %1601 = vrot.lane.b32.xlu0 %v3358_v46, %s3128_s17 }
 0x7dd   : > { %1766 = vrot.lane.b32.xlu1 %v3355_v45, %s3129_s25 }
 0x7e1   : > { %1844 = vrot.lane.b32.xlu1 %v3360_v47, %s3129_s25 }
 0x7e5   : > { %1842 = vrot.lane.b32.xlu1 %v3360_v47, %s3130_s26 }
 0x851   : > { %v1581_v6 = vpop.xlane.xlu0 %1580 }
 0x852   : > { %v1585_v7 = vsub.f32 %v1577_v60, %v1581_v6  ;;  %v2113_v6 = vld [vmem:[%s3285_s0 + $0x20] sm:$0xff] }
 0x854   : > { %v1587_v8 = vmul.f32 1.442695, %v1585_v7  ;;  %v2114_v7 = vld [vmem:[%s3285_s0 + $0x28] sm:$0xff] }
 0x855   : > { %v1584_v9 = vpop.xlane.xlu1 %1583  ;;  %v1602_v10 = vpop.permute.xlu0 %1601 }
 0x856   : > { %3009 = vpow2.f32 %v1587_v8  ;;  %v1586_v11 = vsub.f32 %v1578_v1, %v1584_v9  ;;  %2804 = vmatpush3.msra.mxu1 %v1602_v10  ;;  %v2111_v1 = vld [vmem:[%s3285_s0 + $0x10] sm:$0xff]  ;;  %v2898_v8 = vpack.c.bf16 %v2114_v7, %v2113_v6  ;;  %v2116_v10 = vld [vmem:[%s3285_s0 + $0x38] sm:$0xff] }
 0x857   : > { %2813 = vmatprep.subr.mxu1 %v3122_v23  ;;  %v2894_v5 = vpack.c.bf16 %v2112_v4, %v2111_v1  ;;  %v2115_v9 = vld [vmem:[%s3285_s0 + $0x30] sm:$0xff]  ;;  %v2360_v1 = vld [vmem:[%s3308_s4 + $0x20] sm:$0xff]  ;;  %v2361_v4 = vld [vmem:[%s3308_s4 + $0x28] sm:$0xff] }
 0x858   : > { %v1589_v12 = vmul.f32 1.442695, %v1586_v11  ;;  %v2902_v11 = vpack.c.bf16 %v2116_v10, %v2115_v9  ;;  %v2362_v6 = vld [vmem:[%s3308_s4 + $0x30] sm:$0xff]  ;;  %v2363_v7 = vld [vmem:[%s3308_s4 + $0x38] sm:$0xff]  ;;  %v2681_v9 = vld [vmem:[%s590_s14] ss:$0 sm:$0xff] }
 0x859   : > { %v1678_v13 = vpop.permute.xlu1 %1677 }
 0x85a   : > { %3011 = vpow2.f32 %v1589_v12  ;;  %2809 = vmatpush3.msra.mxu0 %v1678_v13 }
 0x85b   : > { %2818 = vmatprep.subr.mxu0 %v3122_v23 }
 0x85d   : > { %v1767_v19 = vpop.permute.xlu1 %1766 }
 0x860   : > { %v3010_v14 = vpop.eup %3009 }
 0x861   : > { %v1591_v15 = vsel %vm905_vm4, %v3010_v14, 0.0  ;;  %v1845_v24 = vpop.permute.xlu1 %1844 }
 0x862   : > { %1592 = vadd.xlane.f32.xlu0 %v1591_v15 }
 0x864   : > { %v3012_v47 = vpop.eup %3011 }
 0x865   : > { %v1594_v16 = vsel %vm905_vm4, %v3012_v47, 0.0  ;;  %v1843_v26 = vpop.permute.xlu1 %1842 }
 0x866   : > { %1595 = vadd.xlane.f32.xlu0 %v1594_v16 }
 0x87c   : > { %1764 = vrot.lane.b32.xlu0 %v3355_v45, %s3130_s26 }
 0x8ef   : > { %v1593_v17 = vpop.xlane.xlu0 %1592 }
 0x8f0   : > { %3013 = vrcp.f32 %v1593_v17 }
 0x8f3   : > { %v1596_v18 = vpop.xlane.xlu0 %1595 }
 0x8f4   : > { %3015 = vrcp.f32 %v1596_v18 }
 0x8f7   : > { %v1765_v45 = vpop.permute.xlu0 %1764 }
 0x8fa   : > { %v3014_v20 = vpop.eup %3013 }
 0x8fb   : > { %v1599_v21 = vmul.f32 %v3014_v20, %v3010_v14  ;;  %v2678_v20 = vld [vmem:[%s3644_s21] ss:$0 sm:$0xff] }
 0x8fd   : > { %2806 = vmatmul.mubr.msk.f32.vlgmr.msra.gmra.mrb[14].mxu1 %vm905_vm4, %v1599_v21 }
 0x8fe   : > { %v3016_v22 = vpop.eup %3015  ;;  %2814 = vmatpush3.xpose.msk.msra.mxu1 %vm751_vm3, %v1767_v19  ;;  %2815 = vmatprep.mubr.msk.f32.mxu1 %vm3123_vm2, %v3122_v23 }
 0x8ff   : > { %v1600_v25 = vmul.f32 %v3016_v22, %v3012_v47  ;;  %2823 = vmatprep.subr.mxu1 %v3122_v23 }
 0x901   : > { %2811 = vmatmul.mubr.msk.f32.vlgmr.msra.gmra.mrb[10].mxu0 %vm905_vm4, %v1600_v25  ;;  %2816 = vmatmul.mubr.msk.f32.vlgmr.msra.gmra.mrb[16].mxu1 %vm751_vm3, %v1765_v45 }
 0x902   : > { %2819 = vmatpush3.xpose.msk.msra.mxu0 %vm751_vm3, %v1845_v24  ;;  %2820 = vmatprep.mubr.msk.f32.mxu0 %vm3123_vm2, %v3122_v23 }
 0x903   : > { %2828 = vmatprep.subr.mxu0 %v3122_v23  ;;  %2825 = vmatprep.mubr.msk.f32.mxu1 %vm3123_vm2, %v3122_v23 }
 0x905   : > { %2821 = vmatmul.mubr.msk.f32.vlgmr.msra.gmra.mrb[12].mxu0 %vm751_vm3, %v1843_v26 }
 0x906   : > { %2830 = vmatprep.mubr.msk.f32.mxu0 %vm3123_vm2, %v3122_v23 }
 0x9d0   : > { %v1673_v27 = vpop.f32.mrb[14].mxu1 }
 0x9d1   : > { %v2807_v28 = vpop.f32.mrb[15].mxu1 }
 0x9d4   : > { %v1749_v29 = vpop.f32.mrb[10].mxu0  ;;  %v1838_v30 = vpop.f32.mrb[16].mxu1 }
 0x9d5   : > { %v1920_v31 = vmul.f32 0.25, %v1838_v30  ;;  %v2812_v32 = vpop.f32.mrb[11].mxu0  ;;  %v2817_v33 = vpop.f32.mrb[17].mxu1 }
 0x9d7   : > { %v1922_v34 = vsel %vm905_vm4, %v1920_v31, -inf }
 0x9d8   : > { %v1916_v35 = vpop.f32.mrb[12].mxu0  ;;  %1923 = vmax.xlane.f32.xlu0 %v1922_v34 }
 0x9d9   : > { %v1921_v36 = vmul.f32 0.25, %v1916_v35  ;;  %v2822_v37 = vpop.f32.mrb[13].mxu0 }
 0x9da   : > { %v2255_v37 = vld [vmem:[%s3303_s12 + $0x8] sm:$0xff] }
 0x9db   : > { %v1925_v38 = vsel %vm905_vm4, %v1921_v36, -inf }
 0x9dc   : > { %1926 = vmax.xlane.f32.xlu1 %v1925_v38 }
 0x9ed   : > { %2020 = vrot.lane.b32.xlu1 %v3363_v48, %s3130_s26 }
 0x9f1   : > { %1412 = vrot.lane.b32.xlu1 %v3445_v56, %s3129_s25 }
 0x9f5   : > { %1414 = vrot.lane.b32.xlu1 %v3447_v58, %s3129_s25 }
 0x9f9   : > { %1757 = vrot.lane.b32.xlu1 %v1749_v29, %s3127_s24 }
 0xa65   : > { %v1924_v23 = vpop.xlane.xlu0 %1923 }
 0xa66   : > { %v1928_v39 = vsub.f32 %v1920_v31, %v1924_v23  ;;  %v2256_v23 = vld [vmem:[%s3303_s12 + $0x10] sm:$0xff] }
 0xa68   : > { %v1930_v40 = vmul.f32 1.442695, %v1928_v39  ;;  %v2257_v39 = vld [vmem:[%s3303_s12 + $0x18] sm:$0xff] }
 0xa69   : > { %v1927_v41 = vpop.xlane.xlu1 %1926 }
 0xa6a   : > { %3017 = vpow2.f32 %v1930_v40  ;;  %v1929_v42 = vsub.f32 %v1921_v36, %v1927_v41  ;;  %v2254_v36 = vld [vmem:[%s3303_s12] sm:$0xff]  ;;  %v2910_v40 = vpack.c.bf16 %v2257_v39, %v2256_v23 }
 0xa6b   : > { %v2906_v38 = vpack.c.bf16 %v2255_v37, %v2254_v36 }
 0xa6c   : > { %v1932_v43 = vmul.f32 1.442695, %v1929_v42 }
 0xa6d   : > { %v2021_v44 = vpop.permute.xlu1 %2020 }
 0xa6e   : > { %3019 = vpow2.f32 %v1932_v43  ;;  %2829 = vmatpush3.msra.mxu0 %v2021_v44 }
 0xa6f   : > { %2907 = vmatprep.subr.bf16.mxu0 %v2906_v38 }
 0xa71   : > { %v1413_v48 = vpop.permute.xlu1 %1412 }
 0xa72   : > { %1419 = vst.msk [vmem:[#allocation2] sm:$0xff] %vm1418_vm5, %v1413_v48 }
 0xa74   : > { %v3018_v49 = vpop.eup %3017 }
 0xa75   : > { %v1415_v50 = vpop.permute.xlu1 %1414  ;;  %v1934_v51 = vsel %vm905_vm4, %v3018_v49, 0.0 }
 0xa76   : > { %1420 = vst.msk [vmem:[#allocation2 + $0x8] sm:$0xff] %vm1418_vm5, %v1415_v50  ;;  %1935 = vadd.xlane.f32.xlu0 %v1934_v51  ;;  %v2679_v51 = vld [vmem:[%s579_s27] ss:$0 sm:$0xff] }
 0xa78   : > { %v3020_v52 = vpop.eup %3019 }
 0xa79   : > { %v1758_v53 = vpop.permute.xlu1 %1757  ;;  %v1937_v54 = vsel %vm905_vm4, %v3020_v52, 0.0 }
 0xa7a   : > { %1763 = vst.msk [vmem:[#allocation2 + $0x8] sm:$0xff] %vm1761_vm6, %v1758_v53  ;;  %1938 = vadd.xlane.f32.xlu0 %v1937_v54  ;;  %v2680_v53 = vld [vmem:[%s582_s22] ss:$0 sm:$0xff] }
 0xa90   : > { %1944 = vrot.lane.b32.xlu0 %v3358_v46, %s3130_s26 }
 0xa94   : > { %1755 = vrot.lane.b32.xlu0 %v1673_v27, %s3127_s24 }
 0xb03   : > { %v1936_v55 = vpop.xlane.xlu0 %1935 }
 0xb04   : > { %3021 = vrcp.f32 %v1936_v55 }
 0xb07   : > { %v1939_v56 = vpop.xlane.xlu0 %1938 }
 0xb08   : > { %3023 = vrcp.f32 %v1939_v56 }
 0xb0b   : > { %v1945_v57 = vpop.permute.xlu0 %1944 }
 0xb0c   : > { %2824 = vmatpush3.msra.mxu1 %v1945_v57 }
 0xb0d   : > { %2891 = vmatprep.subr.bf16.mxu1 %v2890_v0 }
 0xb0e   : > { %v3022_v58 = vpop.eup %3021 }
 0xb0f   : > { %v1942_v59 = vmul.f32 %v3022_v58, %v3018_v49  ;;  %v1756_v60 = vpop.permute.xlu0 %1755 }
 0xb10   : > { %1762 = vst.msk [vmem:[#allocation2] sm:$0xff] %vm1761_vm6, %v1756_v60  ;;  %v2356_v60 = vld [vmem:[%s3308_s4] sm:$0xff] }
 0xb11   : > { %2826 = vmatmul.mubr.msk.f32.vlgmr.msra.gmra.mrb[18].mxu1 %vm905_vm4, %v1942_v59 }
 0xb12   : > { %v3024_v46 = vpop.eup %3023  ;;  %2893 = vmatpush3.bf16.msra.mxu1 %v2890_v0  ;;  %v2918_v0 = vpack.c.bf16 %v2359_v63, %v2358_v62 }
 0xb13   : > { %v1943_v61 = vmul.f32 %v3024_v46, %v3020_v52  ;;  %2895 = vmatprep.subr.bf16.mxu1 %v2894_v5  ;;  %v2357_v46 = vld [vmem:[%s3308_s4 + $0x8] sm:$0xff] }
 0xb15   : > { %2831 = vmatmul.mubr.msk.f32.vlgmr.msra.gmra.mrb[14].mxu0 %vm905_vm4, %v1943_v61  ;;  %v2914_v61 = vpack.c.bf16 %v2357_v46, %v2356_v60 }
 0xb16   : > { %2897 = vmatpush3.bf16.msra.mxu1 %v2894_v5  ;;  %2909 = vmatpush3.bf16.msra.mxu0 %v2906_v38  ;;  %v2922_v5 = vpack.c.bf16 %v2361_v4, %v2360_v1 }
 0xb17   : > { %2899 = vmatprep.subr.bf16.mxu1 %v2898_v8  ;;  %2911 = vmatprep.subr.bf16.mxu0 %v2910_v40 }
 0xb1a   : > { %2901 = vmatpush3.bf16.msra.mxu1 %v2898_v8  ;;  %2913 = vmatpush3.bf16.msra.mxu0 %v2910_v40  ;;  %v2926_v8 = vpack.c.bf16 %v2363_v7, %v2362_v6 }
 0xb1b   : > { %2903 = vmatprep.subr.bf16.mxu1 %v2902_v11  ;;  %2915 = vmatprep.subr.bf16.mxu0 %v2914_v61 }
 0xb1e   : > { %2905 = vmatpush3.bf16.msra.mxu1 %v2902_v11 }
 0xbe4   : > { %v2016_v12 = vpop.f32.mrb[18].mxu1 }
 0xbe5   : > { %2098 = vrot.lane.b32.xlu0 %v2016_v12, %s3125_s28  ;;  %v2827_v13 = vpop.f32.mrb[19].mxu1 }
 0xbe8   : > { %v2092_v14 = vpop.f32.mrb[14].mxu0 }
 0xbe9   : > { %2100 = vrot.lane.b32.xlu1 %v2092_v14, %s3125_s28  ;;  %v2832_v15 = vpop.f32.mrb[15].mxu0  ;;  %s3645_s28 = sadd.s32 4294967295, %s3117_s23  }
 0xbea   : > { %p3572_p6 = scmp.eq.s32.totalorder %s3645_s28, 1 }
 0xbec   : > { %p3063_p10 = pnand %p3062_p8, %p3572_p6 }
 0xbee   : > { %p3064_p11 = pneg %p3063_p10 }
 0xbf0   : > { %p3071_p1 = pnand %p3070_p0, %p3064_p11 }
 0xc57   : > { %v2099_v47 = vpop.permute.xlu0 %2098 }
 0xc58   : > { %2105 = vst.msk [vmem:[#allocation2] sm:$0xff] %vm2104_vm7, %v2099_v47 }
 0xc5b   : > { %v2101_v16 = vpop.permute.xlu1 %2100 }
 0xc5c   : > { %2106 = vst.msk [vmem:[#allocation2 + $0x8] sm:$0xff] %vm2104_vm7, %v2101_v16 }
 0xc5f   : > { %v2107_v17 = vld [vmem:[#allocation2] sm:$0xff] }
 0xc60   : > { %2849 = vmatprep.mubr.msk.f32.mxu1 %vm2117_vm8, %v2107_v17 }
 0xc63   : > { %v2108_v18 = vld [vmem:[#allocation2 + $0x8] sm:$0xff] }
 0xc64   : > { %2850 = vmatmul.mubr.msk.f32.vlgmr.msra.gmra.mrb[20].mxu1 %vm2117_vm8, %v2108_v18 }
 0xd37   : > { %v2851_v19 = vpop.f32.mrb[20].mxu1 }
 0xd38   : > { %v2200_v21 = vadd.f32 %v2851_v19, %v3317_v3  ;;  %v2190_v22 = vpop.f32.mrb[21].mxu1 }
 0xd39   : > { %v2199_v24 = vadd.f32 %v2190_v22, %v3315_v2 }
 0xd3a   : > { %v3520_v25 = vadd.f32 %v2678_v20, %v2200_v21 }
 0xd3b   : > { %v3522_v45 = vadd.f32 %v2678_v20, %v2199_v24 }
 0xd3c   : > { %v2215_v26 = vsel %vm613_vm1, %v3520_v25, 0.0 }
 0xd3d   : > { %2216 = vadd.xlane.f32.xlu1 %v2215_v26  ;;  %v2212_v27 = vsel %vm613_vm1, %v3522_v45, 0.0  ;;  %v2686_v26 = vld [vmem:[%s598_s18] ss:$0 sm:$0xff] }
 0xd3e   : > { %2213 = vadd.xlane.f32.xlu0 %v2212_v27 }
 0xdca   : > { %v2217_v28 = vpop.xlane.xlu1 %2216 }
 0xdcb   : > { %v2219_v29 = vmul.f32 0.03125, %v2217_v28  ;;  %v2214_v3 = vpop.xlane.xlu0 %2213 }
 0xdcc   : > { %v2218_v2 = vmul.f32 0.03125, %v2214_v3 }
 0xdcd   : > { %v2221_v30 = vsub.f32 %v3520_v25, %v2219_v29 }
 0xdce   : > { %v2220_v31 = vsub.f32 %v3522_v45, %v2218_v2 }
 0xdcf   : > { %v2223_v34 = vmul.f32 %v2221_v30, %v2221_v30 }
 0xdd0   : > { %v2222_v32 = vmul.f32 %v2220_v31, %v2220_v31 }
 0xdd1   : > { %v2227_v35 = vsel %vm613_vm1, %v2223_v34, 0.0 }
 0xdd2   : > { %v2224_v33 = vsel %vm613_vm1, %v2222_v32, 0.0 }
 0xdd3   : > { %2225 = vadd.xlane.f32.xlu0 %v2224_v33 }
 0xdd7   : > { %2228 = vadd.xlane.f32.xlu0 %v2227_v35 }
 0xe60   : > { %v2226_v41 = vpop.xlane.xlu0 %2225 }
 0xe61   : > { %v2230_v42 = vmul.f32 0.03125, %v2226_v41 }
 0xe63   : > { %v2232_v43 = vadd.f32 1e-05, %v2230_v42 }
 0xe64   : > { %v2229_v44 = vpop.xlane.xlu0 %2228 }
 0xe65   : > { %3025 = vrsqrt.f32 %v2232_v43  ;;  %v2231_v48 = vmul.f32 0.03125, %v2229_v44 }
 0xe67   : > { %v2233_v49 = vadd.f32 1e-05, %v2231_v48 }
 0xe69   : > { %3027 = vrsqrt.f32 %v2233_v49 }
 0xe6f   : > { %v3026_v50 = vpop.eup %3025 }
 0xe70   : > { %v2236_v52 = vmul.f32 %v3026_v50, %v2220_v31 }
 0xe72   : > { %v2244_v54 = vmul.f32 %v2679_v51, %v2236_v52 }
 0xe73   : > { %v3028_v55 = vpop.eup %3027 }
 0xe74   : > { %v2237_v56 = vmul.f32 %v3028_v55, %v2221_v30  ;;  %v2252_v57 = vadd.f32 %v2680_v53, %v2244_v54 }
 0xe76   : > { %v2245_v58 = vmul.f32 %v2679_v51, %v2237_v56  ;;  %2860 = vmatprep.mubr.msk.f32.mxu0 %vm613_vm1, %v2252_v57 }
 0xe78   : > { %v2253_v59 = vadd.f32 %v2680_v53, %v2245_v58 }
 0xe7a   : > { %2861 = vmatmul.mubr.msk.f32.vlgmr.msra.gmra.mrb[16].mxu0 %vm613_vm1, %v2253_v59 }
 0xe7b   : > { %2917 = vmatpush3.bf16.msra.mxu0 %v2914_v61 }
 0xe7c   : > { %2919 = vmatprep.subr.bf16.mxu0 %v2918_v0 }
 0xe7f   : > { %2921 = vmatpush3.bf16.msra.mxu0 %v2918_v0 }
 0xe80   : > { %2923 = vmatprep.subr.bf16.mxu0 %v2922_v5 }
 0xe83   : > { %2925 = vmatpush3.bf16.msra.mxu0 %v2922_v5 }
 0xe84   : > { %2927 = vmatprep.subr.bf16.mxu0 %v2926_v8 }
 0xe87   : > { %2929 = vmatpush3.bf16.msra.mxu0 %v2926_v8 }
 0xf4d   : > { %v2862_v10 = vpop.f32.mrb[16].mxu0 }
 0xf4e   : > { %v2343_v11 = vadd.f32 %v2862_v10, %v2681_v9  ;;  %v2337_v12 = vpop.f32.mrb[17].mxu0 }
 0xf4f   : > { %v2338_v13 = vadd.f32 %v2681_v9, %v2337_v12 }
 0xf50   : > { %v2349_v14 = vmul.f32 0.70710677, %v2343_v11  ;;  %v2347_v20 = vmul.f32 0.5, %v2343_v11 }
 0xf51   : > { %v2348_v15 = vmul.f32 0.70710677, %v2338_v13  ;;  %v2346_v18 = vmul.f32 0.5, %v2338_v13 }
 0xf52   : > { %3029 = verf.f32 %v2349_v14 }
 0xf53   : > { %3031 = verf.f32 %v2348_v15 }
 0xf5c   : > { %v3030_v47 = vpop.eup %3029 }
 0xf5d   : > { %v3032_v16 = vpop.eup %3031  ;;  %v2353_v17 = vadd.f32 1.0, %v3030_v47 }
 0xf5e   : > { %v2352_v19 = vadd.f32 1.0, %v3032_v16 }
 0xf5f   : > { %v2355_v22 = vmul.f32 %v2353_v17, %v2347_v20 }
 0xf60   : > { %v2354_v21 = vmul.f32 %v2352_v19, %v2346_v18 }
 0xf62   : > { %2879 = vmatprep.mubr.msk.f32.mxu0 %vm2117_vm8, %v2354_v21 }
 0xf63   : > { %2880 = vmatmul.mubr.msk.f32.vlgmr.msra.gmra.mrb[18].mxu0 %vm2117_vm8, %v2355_v22 }
0x1036   : > { %v2881_v24 = vpop.f32.mrb[18].mxu0 }
0x1037   : > { %v2446_v27 = vadd.f32 %v2881_v24, %v3520_v25  ;;  %v2436_v28 = vpop.f32.mrb[19].mxu0 }
0x1038   : > { %v2445_v29 = vadd.f32 %v2436_v28, %v3522_v45 }
0x1039   : > { %v2455_v3 = vadd.f32 %v2686_v26, %v2446_v27 }
0x103a   : > { %v2454_v2 = vadd.f32 %v2686_v26, %v2445_v29 }
0x103b   : > { %2457 = vst.msk [vmem:[#allocation6 + $0x8] sm:$0xff] %vm613_vm1, %v2455_v3 }
0x103c   : > { %2456 = vst.msk [vmem:[#allocation6] sm:$0xff] %vm613_vm1, %v2454_v2 }
0x103d   : > { %3074 = shalt.err (!%p3071_p1)
}
0x103e   : > { %s3647_s17 = sld [smem:[#allocation14_spill]] }
0x1044   : > { %s3075_s25 = scalar_lea.hbm %s3647_s17, 256 }
0x1045   : > { %p3076_p2 = scmp.ne.s32.totalorder %s3647_s17, %s3075_s25  ;;  %p3081_p9 = scmp.lt.u32.totalorder %s3075_s25, %s3647_s17 }
0x1047   : > { %p3077_p5 = pnand %p3076_p2, %p3572_p6 }
0x1049   : > { %p3078_p7 = pneg %p3077_p5 }
0x104b   : > { %p3083_p3 = pnand %p3081_p9, %p3078_p7 }
0x104d   : > { %3086 = shalt.err (!%p3083_p3)
}
0x104e   : > { %s3132_s19 = smov 128   ;;  %s3133_s13 = smov 8  }
0x104f   : > { %2939 = dma.vmem_to_hbm [thread:$0]  (%p3572_p6), %s2468_s20, 256, %s3647_s17, [#allocation5], %s3132_s19, %s3132_s19, %s3133_s13  }
0x1050   : > { %3104 = dma.done.wait (%p3572_p6), [#allocation5], 256  }
0x1051   : > { %3106 = vsyncadd (%p3572_p6), [#allocation5], 4294967040 }
0x1052 PF: > { %s24_s23 = sadd.s32 1, %s3117_s23   ;;  %s3648_s21 = sld [smem:[#allocation9_spill]] }
0x1053   : > { %p21_p4 = scmp.ge.s32.totalorder %s24_s23, 4   ;;  %s3649_s22 = sld [smem:[#allocation10_spill]] }
0x1055   :  { %23 = sbr.rel (!%p21_p4) target bundleno = 8 (0x8), region = 136 }
0x105c   :  { %2483 = vsyncpa [#allocation4], 1 }
0x105d   :  { %2485 = vsyncpa [#allocation4 + $0x1], 1 }
0x105e   :  { %2486 = vsyncpa [#allocation5], 1 }
0x105f   :  { %2488 = vsyncpa [#allocation5 + $0x1], 1 }

</bundles_post_ra>
